<compile_context>
chip_gen: v7x
topology: tpu7x:2x2x1
jax: 0.10.0
libtpu: 0.0.40
codegen_flags: <defaults>
</compile_context>

<pallas_src>
import functools

import jax
import jax.numpy as jnp
from jax.experimental import pallas as pl
from jax.experimental.pallas import tpu as pltpu

NEG_SLOPE = 0.2
BN_EPS = 1e-5


# --------------------------------------------------------------------------- #
# Fused Pallas kernel                                                          #
# --------------------------------------------------------------------------- #

def _disc_fused_kernel(x1_ref, w1_ref, b1_ref, m1_ref, w2_ref, cmask_ref,
                       gam_ref, bet_ref, wlin_ref, bl_ref,
                       out_ref,
                       y1_ref, conv_ref, sum_ref, sq_ref,
                       *, bblk, rows2, wh2, n_valid, total_batch):
    """Fused Discriminator forward for one block of `bblk` batch elements.

    x1_ref   : (bblk, R, 128) bf16   phase-grouped conv1 im2col (R = hh2*wh2 + 1)
    w1_ref   : (128, 256)     bf16   block-diagonal conv1 weight (4 x (32, 64))
    b1_ref   : (1, 256)       f32    conv1 bias tiled over the 4 phases
    m1_ref   : (R, 256)       f32    0/1 padding mask of phase-packed layer-1 act
    w2_ref   : (4, 256, 128)  bf16   conv2 weights grouped by row shift (K = 256)
    cmask_ref: (rows2, 1)     f32    0/1 mask of valid (non-junk) conv2 rows
    gam/bet  : (1, 128)       f32    BatchNorm weight / bias
    wlin_ref : (rows2, 128)   f32    Linear weight, Flatten folded, junk rows = 0
    bl_ref   : (1, 1)         f32    Linear bias
    out_ref  : (B, 1)         f32    sigmoid(logits), written in the last step
    """
    step = pl.program_id(0)
    nsteps = pl.num_programs(0)

    @pl.when(step == 0)
    def _init():
        sum_ref[...] = jnp.zeros_like(sum_ref)
        sq_ref[...] = jnp.zeros_like(sq_ref)

    shifts = (0, 1, wh2, wh2 + 1)
    cmask = cmask_ref[...]
    psum = jnp.zeros((1, 128), jnp.float32)
    psq = jnp.zeros((1, 128), jnp.float32)

    for bb in range(bblk):
        gb = step * bblk + bb

        # ---- conv1 (MXU, K=128, N=256) + bias + LeakyReLU + padding mask -----
        a1 = jnp.dot(x1_ref[bb], w1_ref[...],
                     preferred_element_type=jnp.float32)            # (R, 256)
        a1 = a1 + b1_ref[...]
        a1 = jnp.where(a1 >= 0, a1, NEG_SLOPE * a1)
        y1_ref[...] = (a1 * m1_ref[...]).astype(jnp.bfloat16)       # phase-packed

        # ---- conv2: 4 lane-dense (rows2, 256) x (256, 128) MXU matmuls -------
        acc = jnp.zeros((rows2, 128), jnp.float32)
        for si in range(4):
            s = shifts[si]
            acc = acc + jnp.dot(y1_ref[s:s + rows2, :], w2_ref[si],
                                preferred_element_type=jnp.float32)
        # conv2 bias intentionally omitted: training-mode BatchNorm's mean
        # subtraction cancels it exactly (verified against the reference).

        conv_ref[gb] = acc.astype(jnp.bfloat16)   # resident pre-BN activations

        # ---- BatchNorm batch statistics (junk output columns masked) ---------
        masked = acc * cmask
        psum = psum + jnp.sum(masked, axis=0, keepdims=True)
        psq = psq + jnp.sum(masked * acc, axis=0, keepdims=True)

    sum_ref[...] += psum
    sq_ref[...] += psq

    # ---- finalize: BN affine + LeakyReLU + Linear + Sigmoid -------------------
    @pl.when(step == nsteps - 1)
    def _finalize():
        inv_n = 1.0 / float(n_valid)
        mean = sum_ref[...] * inv_n
        # TODO(synk): single-pass E[x^2]-E[x]^2 in f32; a two-pass variance over
        # the resident conv_ref would be more robust for large-mean activations.
        var = sq_ref[...] * inv_n - mean * mean
        scale = gam_ref[...] * jax.lax.rsqrt(var + BN_EPS)
        shift = bet_ref[...] - mean * scale
        wlin = wlin_ref[...]
        parts = []
        for b in range(total_batch):            # trace-time unrolled (small B)
            a = conv_ref[b].astype(jnp.float32) * scale + shift
            a = jnp.where(a >= 0, a, NEG_SLOPE * a)
            # rows-first reduction (VPU adds); one lane reduction per element below
            parts.append(jnp.sum(a * wlin, axis=0, keepdims=True))  # (1, 128)
        logits = jnp.sum(jnp.concatenate(parts, axis=0), axis=1, keepdims=True)
        out_ref[...] = jax.nn.sigmoid(logits + bl_ref[...])


# --------------------------------------------------------------------------- #
# Wrapper: layout construction + pallas_call                                   #
# --------------------------------------------------------------------------- #

def _choose_bblk(batch):
    if batch <= 8:
        return batch
    for d in (8, 4, 2):
        if batch % d == 0:
            return d
    return 1


def init_params(key, image_size):
    ks = jax.random.split(key, 7)
    # PyTorch layouts: conv weight (Cout, Cin, KH, KW), linear weight (out, in).
    w1 = jax.random.normal(ks[0], (64, 2, 4, 4), jnp.float32) * 0.05
    b1 = jax.random.normal(ks[1], (64,), jnp.float32) * 0.05
    w2 = jax.random.normal(ks[2], (128, 64, 4, 4), jnp.float32) * 0.02
    b2 = jax.random.normal(ks[3], (128,), jnp.float32) * 0.1   # cancelled by BN
    gamma = 1.0 + 0.1 * jax.random.normal(ks[4], (128,), jnp.float32)
    beta = 0.1 * jax.random.normal(ks[5], (128,), jnp.float32)
    feat = 128 * (image_size // 4) * (image_size // 4)
    wl = jax.random.normal(ks[6], (1, feat), jnp.float32) * 0.02
    bl = jnp.full((1,), 0.1, jnp.float32)
    return dict(w1=w1, b1=b1, w2=w2, b2=b2, gamma=gamma, beta=beta, wl=wl, bl=bl)


@jax.jit
def discriminator_forward(params, cap_img, recon_img):
    # cap_img, recon_img: (B, 1, H, W) float32 (PyTorch NCHW convention)
    x = jnp.concatenate([cap_img, recon_img], axis=1)          # (B, 2, H, W)
    batch, _, H, W = x.shape
    assert H % 4 == 0 and W % 4 == 0
    oh1, ow1 = H // 2, W // 2
    oh2, ow2 = oh1 // 2, ow1 // 2
    hh2, wh2 = oh2 + 1, ow2 + 1
    rows2 = oh2 * wh2                      # conv2 output rows (incl. junk column)
    rows_packed = hh2 * wh2 + 1            # phase-packed layer-1 rows (+1 pad row)
    eh, ew = oh1 + 2, ow1 + 2              # extended conv1 grid (= 2*hh2, 2*wh2)
    bblk = _choose_bblk(batch)

    # ---- conv1 im2col, grouped by conv2 parity phase (channel-concatenated) ---
    x_nhwc = jnp.transpose(x, (0, 2, 3, 1))                    # (B, H, W, 2)
    xp3 = jnp.pad(x_nhwc, ((0, 0), (3, 3), (3, 3), (0, 0)))
    taps = []
    for dh in range(4):
        for dw in range(4):
            taps.append(xp3[:, dh:dh + 2 * eh:2, dw:dw + 2 * ew:2, :])
    pe = jnp.stack(taps, axis=3).reshape(batch, eh, ew, 32)    # (dh*4+dw)*2+cin
    pe = pe.reshape(batch, hh2, 2, wh2, 2, 32).transpose(0, 1, 3, 2, 4, 5)
    pe = pe.reshape(batch, hh2 * wh2, 128)
    x1 = jnp.pad(pe, ((0, 0), (0, 1), (0, 0))).astype(jnp.bfloat16)

    # ---- padding mask of the phase-packed layer-1 activation ------------------
    vi = ((jnp.arange(eh) >= 1) & (jnp.arange(eh) <= oh1)).astype(jnp.float32)
    vj = ((jnp.arange(ew) >= 1) & (jnp.arange(ew) <= ow1)).astype(jnp.float32)
    mext = (vi[:, None] * vj[None, :]).reshape(hh2, 2, wh2, 2).transpose(0, 2, 1, 3)
    m1 = jnp.broadcast_to(mext[..., None], (hh2, wh2, 2, 2, 64))
    m1 = jnp.pad(m1.reshape(hh2 * wh2, 256), ((0, 1), (0, 0)))  # (R, 256)

    # ---- weights in kernel layouts --------------------------------------------
    w1_mat = jnp.transpose(params["w1"], (2, 3, 1, 0)).reshape(32, 64)
    w1big = jnp.kron(jnp.eye(4, dtype=jnp.float32), w1_mat).astype(jnp.bfloat16)
    b1big = jnp.tile(params["b1"], 4).reshape(1, 256)

    w2t = jnp.transpose(params["w2"], (2, 3, 1, 0))             # (dh, dw, cin, cout)
    w2g = w2t.reshape(2, 2, 2, 2, 64, 128).transpose(0, 2, 1, 3, 4, 5)
    w2g = w2g.reshape(4, 256, 128).astype(jnp.bfloat16)         # grouped by shift

    col = (jnp.arange(wh2) < ow2).astype(jnp.float32)
    cmask = jnp.tile(col, oh2).reshape(rows2, 1)                # valid conv2 rows

    # Fold nn.Flatten()'s NCHW ordering into the linear weight; junk column -> 0.
    wl3 = params["wl"].reshape(128, oh2, ow2).transpose(1, 2, 0)
    wlin = jnp.pad(wl3, ((0, 0), (0, 1), (0, 0))).reshape(rows2, 128)

    gamma2 = params["gamma"].reshape(1, 128)
    beta2 = params["beta"].reshape(1, 128)
    bl2 = params["bl"].reshape(1, 1)

    # ---- explicit VMEM budget (v7x-safe: capped at 64 MiB) --------------------
    est = (2 * bblk * rows_packed * 128 * 2            # double-buffered x1 blocks
           + 128 * 256 * 2 + 256 * 4                   # w1big, b1big
           + rows_packed * 256 * 4                     # m1
           + 4 * 256 * 128 * 2                         # w2g
           + rows2 * 4 + 2 * 128 * 4                   # cmask, gamma, beta
           + rows2 * 128 * 4 + 4                       # wlin, bl
           + rows_packed * 256 * 2                     # y1 scratch
           + batch * rows2 * 128 * 2                   # conv_ref (bf16 resident)
           + 2 * 128 * 4                               # sum / sumsq
           + rows_packed * 256 * 4                     # a1 temp
           + 2 * rows2 * 128 * 4)                      # acc / finalize temps
    vmem_limit = int(min(64 << 20, max(32 << 20, 2 * est + (4 << 20))))

    kern = functools.partial(
        _disc_fused_kernel, bblk=bblk, rows2=rows2, wh2=wh2,
        n_valid=batch * oh2 * ow2, total_batch=batch)

    return pl.pallas_call(
        kern,
        out_shape=jax.ShapeDtypeStruct((batch, 1), jnp.float32),
        grid=(batch // bblk,),
        in_specs=[
            pl.BlockSpec((bblk, rows_packed, 128), lambda i: (i, 0, 0)),
            pl.BlockSpec((128, 256), lambda i: (0, 0)),
            pl.BlockSpec((1, 256), lambda i: (0, 0)),
            pl.BlockSpec((rows_packed, 256), lambda i: (0, 0)),
            pl.BlockSpec((4, 256, 128), lambda i: (0, 0, 0)),
            pl.BlockSpec((rows2, 1), lambda i: (0, 0)),
            pl.BlockSpec((1, 128), lambda i: (0, 0)),
            pl.BlockSpec((1, 128), lambda i: (0, 0)),
            pl.BlockSpec((rows2, 128), lambda i: (0, 0)),
            pl.BlockSpec((1, 1), lambda i: (0, 0)),
        ],
        out_specs=pl.BlockSpec((batch, 1), lambda i: (0, 0)),
        scratch_shapes=[
            pltpu.VMEM((rows_packed, 256), jnp.bfloat16),     # phase-packed y1
            pltpu.VMEM((batch, rows2, 128), jnp.bfloat16),    # pre-BN conv2 acts
            pltpu.VMEM((1, 128), jnp.float32),                # per-channel sum
            pltpu.VMEM((1, 128), jnp.float32),                # per-channel sum sq
        ],
        compiler_params=pltpu.CompilerParams(
            dimension_semantics=("arbitrary",),
            vmem_limit_bytes=vmem_limit),
    )(x1, w1big, b1big, m1, w2g, cmask, gamma2, beta2, wlin, bl2)


# --------------------------------------------------------------------------- #
# Pure-JAX reference (mirrors the PyTorch module, training-mode BatchNorm)      #
# --------------------------------------------------------------------------- #

@jax.jit
def _reference_forward(params, cap_img, recon_img):
    hi = jax.lax.Precision.HIGHEST
    x = jnp.concatenate([cap_img, recon_img], axis=1)
    y = jax.lax.conv_general_dilated(
        x, params["w1"], (2, 2), ((1, 1), (1, 1)),
        dimension_numbers=("NCHW", "OIHW", "NCHW"), precision=hi)
    y = y + params["b1"][None, :, None, None]
    y = jnp.where(y >= 0, y, NEG_SLOPE * y)
    y = jax.lax.conv_general_dilated(
        y, params["w2"], (2, 2), ((1, 1), (1, 1)),
        dimension_numbers=("NCHW", "OIHW", "NCHW"), precision=hi)
    y = y + params["b2"][None, :, None, None]                  # kernel skips this:
    mean = jnp.mean(y, axis=(0, 2, 3), keepdims=True)          # BN cancels it.
    var = jnp.mean((y - mean) ** 2, axis=(0, 2, 3), keepdims=True)
    y = (y - mean) * jax.lax.rsqrt(var + BN_EPS)
    y = y * params["gamma"][None, :, None, None] + params["beta"][None, :, None, None]
    y = jnp.where(y >= 0, y, NEG_SLOPE * y)
    feat = y.reshape(y.shape[0], -1)
    logits = jnp.dot(feat, params["wl"].T, precision=hi) + params["bl"][None, :]
    return jax.nn.sigmoid(logits)


# --------------------------------------------------------------------------- #
# main                                                                         #
# --------------------------------------------------------------------------- #

if __name__ == "__main__":
    image_size = 16    # small but consistent with the module (multiple of 4)
    batch = 2

    key = jax.random.PRNGKey(0)
    kp, ka, kb = jax.random.split(key, 3)
    params = init_params(kp, image_size)
    cap_img = jax.random.normal(ka, (batch, 1, image_size, image_size), jnp.float32)
    recon_img = jax.random.normal(kb, (batch, 1, image_size, image_size), jnp.float32)

    out = discriminator_forward(params, cap_img, recon_img)
    jax.block_until_ready(out)
    assert out.shape == (batch, 1)

    ref = _reference_forward(params, cap_img, recon_img)
    max_err = float(jnp.max(jnp.abs(out - ref)))
    assert max_err < 5e-2, f"mismatch vs reference: {max_err}"

    print("KERNEL_OK")
</pallas_src>

<mosaic_0001>
module attributes {stable_mosaic.version = 11 : i64} {
  func.func @_disc_fused_kernel(%arg0: i32, %arg1: memref<2x26x128xbf16, #tpu.memory_space<vmem>>, %arg2: memref<128x256xbf16, #tpu.memory_space<vmem>>, %arg3: memref<1x256xf32, #tpu.memory_space<vmem>>, %arg4: memref<26x256xf32, #tpu.memory_space<vmem>>, %arg5: memref<4x256x128xbf16, #tpu.memory_space<vmem>>, %arg6: memref<20x1xf32, #tpu.memory_space<vmem>>, %arg7: memref<1x128xf32, #tpu.memory_space<vmem>>, %arg8: memref<1x128xf32, #tpu.memory_space<vmem>>, %arg9: memref<20x128xf32, #tpu.memory_space<vmem>>, %arg10: memref<1x1xf32, #tpu.memory_space<vmem>>, %arg11: memref<2x1xf32, #tpu.memory_space<vmem>>, %arg12: memref<26x256xbf16, #tpu.memory_space<vmem>>, %arg13: memref<2x20x128xbf16, #tpu.memory_space<vmem>>, %arg14: memref<1x128xf32, #tpu.memory_space<vmem>>, %arg15: memref<1x128xf32, #tpu.memory_space<vmem>>) attributes {dimension_semantics = [#tpu.dimension_semantics<arbitrary>], iteration_bounds = array<i64: 1>, scalar_prefetch = 0 : i64, scratch_operands = 4 : i64, tpu.core_type = #tpu.core_type<tc>, window_params = [{transform_indices = @transform_0, window_bounds = array<i64: 2, 26, 128>}, {pipeline_mode = #tpu.pipeline_mode<synchronous>, transform_indices = @transform_1, window_bounds = array<i64: 128, 256>}, {pipeline_mode = #tpu.pipeline_mode<synchronous>, transform_indices = @transform_2, window_bounds = array<i64: 1, 256>}, {pipeline_mode = #tpu.pipeline_mode<synchronous>, transform_indices = @transform_3, window_bounds = array<i64: 26, 256>}, {pipeline_mode = #tpu.pipeline_mode<synchronous>, transform_indices = @transform_4, window_bounds = array<i64: 4, 256, 128>}, {pipeline_mode = #tpu.pipeline_mode<synchronous>, transform_indices = @transform_5, window_bounds = array<i64: 20, 1>}, {pipeline_mode = #tpu.pipeline_mode<synchronous>, transform_indices = @transform_6, window_bounds = array<i64: 1, 128>}, {pipeline_mode = #tpu.pipeline_mode<synchronous>, transform_indices = @transform_7, window_bounds = array<i64: 1, 128>}, {pipeline_mode = #tpu.pipeline_mode<synchronous>, transform_indices = @transform_8, window_bounds = array<i64: 20, 128>}, {pipeline_mode = #tpu.pipeline_mode<synchronous>, transform_indices = @transform_9, window_bounds = array<i64: 1, 1>}, {pipeline_mode = #tpu.pipeline_mode<synchronous>, transform_indices = @transform_10, window_bounds = array<i64: 2, 1>}]} {
    %c0_i32 = arith.constant 0 : i32
    %0 = arith.cmpi eq, %arg0, %c0_i32 : i32
    %1 = arith.extui %0 : i1 to i32
    %c0_i32_0 = arith.constant 0 : i32
    %2 = arith.cmpi ne, %1, %c0_i32_0 : i32
    scf.if %2 {
      %cst_96 = arith.constant 0.000000e+00 : f32
      %121 = vector.broadcast %cst_96 : f32 to vector<1x128xf32>
      %c0_97 = arith.constant 0 : index
      %c0_98 = arith.constant 0 : index
      %122 = vector.load %arg14[%c0_97, %c0_98] : memref<1x128xf32, #tpu.memory_space<vmem>>, vector<1x128xf32>
      tpu.vector_store %arg14[%c0_97, %c0_98], %121 {strides = array<i32>} : memref<1x128xf32, #tpu.memory_space<vmem>>, vector<1x128xf32>,
      %cst_99 = arith.constant 0.000000e+00 : f32
      %123 = vector.broadcast %cst_99 : f32 to vector<1x128xf32>
      %c0_100 = arith.constant 0 : index
      %c0_101 = arith.constant 0 : index
      %124 = vector.load %arg15[%c0_100, %c0_101] : memref<1x128xf32, #tpu.memory_space<vmem>>, vector<1x128xf32>
      tpu.vector_store %arg15[%c0_100, %c0_101], %123 {strides = array<i32>} : memref<1x128xf32, #tpu.memory_space<vmem>>, vector<1x128xf32>,
    } else {
    }
    %c0 = arith.constant 0 : index
    %c0_1 = arith.constant 0 : index
    %3 = vector.load %arg6[%c0, %c0_1] : memref<20x1xf32, #tpu.memory_space<vmem>>, vector<20x1xf32>
    %cst = arith.constant 0.000000e+00 : f32
    %4 = vector.broadcast %cst : f32 to vector<1x128xf32>
    %cst_2 = arith.constant 0.000000e+00 : f32
    %5 = vector.broadcast %cst_2 : f32 to vector<1x128xf32>
    %c2_i32 = arith.constant 2 : i32
    %6 = arith.muli %arg0, %c2_i32 : i32
    %c0_i32_3 = arith.constant 0 : i32
    %7 = arith.addi %6, %c0_i32_3 : i32
    %c0_4 = arith.constant 0 : index
    %c0_5 = arith.constant 0 : index
    %c0_6 = arith.constant 0 : index
    %8 = vector.load %arg1[%c0_4, %c0_5, %c0_6] : memref<2x26x128xbf16, #tpu.memory_space<vmem>>, vector<1x26x128xbf16>
    %9 = vector.shape_cast %8 : vector<1x26x128xbf16> to vector<26x128xbf16>
    %c0_7 = arith.constant 0 : index
    %c0_8 = arith.constant 0 : index
    %10 = vector.load %arg2[%c0_7, %c0_8] : memref<128x256xbf16, #tpu.memory_space<vmem>>, vector<128x256xbf16>
    %cst_9 = arith.constant dense<0.000000e+00> : vector<26x256xf32>
    %11 = tpu.matmul %9, %10, %cst_9 {dimension_numbers = #tpu.dot_dimension_numbers<[1], [0], [0], [1], [0, 0, 1, 1], [], []>} : vector<26x128xbf16>, vector<128x256xbf16>, vector<26x256xf32> -> vector<26x256xf32>
    %c0_10 = arith.constant 0 : index
    %c0_11 = arith.constant 0 : index
    %12 = vector.load %arg3[%c0_10, %c0_11] : memref<1x256xf32, #tpu.memory_space<vmem>>, vector<1x256xf32>
    %13 = vector.broadcast %12 : vector<1x256xf32> to vector<26x256xf32>
    %14 = arith.addf %11, %13 : vector<26x256xf32>
    %cst_12 = arith.constant 0.000000e+00 : f32
    %15 = vector.broadcast %cst_12 : f32 to vector<26x256xf32>
    %16 = arith.cmpf oge, %14, %15 : vector<26x256xf32>
    %cst_13 = arith.constant 2.000000e-01 : f32
    %17 = vector.broadcast %cst_13 : f32 to vector<26x256xf32>
    %18 = arith.mulf %17, %14 : vector<26x256xf32>
    %19 = arith.select %16, %14, %18 : vector<26x256xi1>, vector<26x256xf32>
    %c0_14 = arith.constant 0 : index
    %c0_15 = arith.constant 0 : index
    %20 = vector.load %arg4[%c0_14, %c0_15] : memref<26x256xf32, #tpu.memory_space<vmem>>, vector<26x256xf32>
    %21 = arith.mulf %19, %20 : vector<26x256xf32>
    %22 = arith.truncf %21 : vector<26x256xf32> to vector<26x256xbf16>
    %c0_16 = arith.constant 0 : index
    %c0_17 = arith.constant 0 : index
    %23 = vector.load %arg12[%c0_16, %c0_17] : memref<26x256xbf16, #tpu.memory_space<vmem>>, vector<26x256xbf16>
    tpu.vector_store %arg12[%c0_16, %c0_17], %22 {strides = array<i32>} : memref<26x256xbf16, #tpu.memory_space<vmem>>, vector<26x256xbf16>,
    %cst_18 = arith.constant 0.000000e+00 : f32
    %24 = vector.broadcast %cst_18 : f32 to vector<20x128xf32>
    %c0_19 = arith.constant 0 : index
    %c0_20 = arith.constant 0 : index
    %25 = vector.load %arg12[%c0_19, %c0_20] : memref<26x256xbf16, #tpu.memory_space<vmem>>, vector<20x256xbf16>
    %c0_21 = arith.constant 0 : index
    %c0_22 = arith.constant 0 : index
    %c0_23 = arith.constant 0 : index
    %26 = vector.load %arg5[%c0_21, %c0_22, %c0_23] : memref<4x256x128xbf16, #tpu.memory_space<vmem>>, vector<1x256x128xbf16>
    %27 = vector.shape_cast %26 : vector<1x256x128xbf16> to vector<256x128xbf16>
    %cst_24 = arith.constant dense<0.000000e+00> : vector<20x128xf32>
    %28 = tpu.matmul %25, %27, %cst_24 {dimension_numbers = #tpu.dot_dimension_numbers<[1], [0], [0], [1], [0, 0, 1, 1], [], []>} : vector<20x256xbf16>, vector<256x128xbf16>, vector<20x128xf32> -> vector<20x128xf32>
    %29 = arith.addf %24, %28 : vector<20x128xf32>
    %c1 = arith.constant 1 : index
    %c0_25 = arith.constant 0 : index
    %30 = vector.load %arg12[%c1, %c0_25] : memref<26x256xbf16, #tpu.memory_space<vmem>>, vector<20x256xbf16>
    %c1_26 = arith.constant 1 : index
    %c0_27 = arith.constant 0 : index
    %c0_28 = arith.constant 0 : index
    %31 = vector.load %arg5[%c1_26, %c0_27, %c0_28] : memref<4x256x128xbf16, #tpu.memory_space<vmem>>, vector<1x256x128xbf16>
    %32 = vector.shape_cast %31 : vector<1x256x128xbf16> to vector<256x128xbf16>
    %cst_29 = arith.constant dense<0.000000e+00> : vector<20x128xf32>
    %33 = tpu.matmul %30, %32, %cst_29 {dimension_numbers = #tpu.dot_dimension_numbers<[1], [0], [0], [1], [0, 0, 1, 1], [], []>} : vector<20x256xbf16>, vector<256x128xbf16>, vector<20x128xf32> -> vector<20x128xf32>
    %34 = arith.addf %29, %33 : vector<20x128xf32>
    %c5 = arith.constant 5 : index
    %c0_30 = arith.constant 0 : index
    %35 = vector.load %arg12[%c5, %c0_30] : memref<26x256xbf16, #tpu.memory_space<vmem>>, vector<20x256xbf16>
    %c2 = arith.constant 2 : index
    %c0_31 = arith.constant 0 : index
    %c0_32 = arith.constant 0 : index
    %36 = vector.load %arg5[%c2, %c0_31, %c0_32] : memref<4x256x128xbf16, #tpu.memory_space<vmem>>, vector<1x256x128xbf16>
    %37 = vector.shape_cast %36 : vector<1x256x128xbf16> to vector<256x128xbf16>
    %cst_33 = arith.constant dense<0.000000e+00> : vector<20x128xf32>
    %38 = tpu.matmul %35, %37, %cst_33 {dimension_numbers = #tpu.dot_dimension_numbers<[1], [0], [0], [1], [0, 0, 1, 1], [], []>} : vector<20x256xbf16>, vector<256x128xbf16>, vector<20x128xf32> -> vector<20x128xf32>
    %39 = arith.addf %34, %38 : vector<20x128xf32>
    %c6 = arith.constant 6 : index
    %c0_34 = arith.constant 0 : index
    %40 = vector.load %arg12[%c6, %c0_34] : memref<26x256xbf16, #tpu.memory_space<vmem>>, vector<20x256xbf16>
    %c3 = arith.constant 3 : index
    %c0_35 = arith.constant 0 : index
    %c0_36 = arith.constant 0 : index
    %41 = vector.load %arg5[%c3, %c0_35, %c0_36] : memref<4x256x128xbf16, #tpu.memory_space<vmem>>, vector<1x256x128xbf16>
    %42 = vector.shape_cast %41 : vector<1x256x128xbf16> to vector<256x128xbf16>
    %cst_37 = arith.constant dense<0.000000e+00> : vector<20x128xf32>
    %43 = tpu.matmul %40, %42, %cst_37 {dimension_numbers = #tpu.dot_dimension_numbers<[1], [0], [0], [1], [0, 0, 1, 1], [], []>} : vector<20x256xbf16>, vector<256x128xbf16>, vector<20x128xf32> -> vector<20x128xf32>
    %44 = arith.addf %39, %43 : vector<20x128xf32>
    %45 = arith.truncf %44 : vector<20x128xf32> to vector<20x128xbf16>
    %46 = arith.index_cast %7 : i32 to index
    %c0_38 = arith.constant 0 : index
    %c0_39 = arith.constant 0 : index
    %47 = vector.load %arg13[%46, %c0_38, %c0_39] : memref<2x20x128xbf16, #tpu.memory_space<vmem>>, vector<1x20x128xbf16>
    %48 = vector.shape_cast %47 : vector<1x20x128xbf16> to vector<20x128xbf16>
    %49 = vector.shape_cast %45 : vector<20x128xbf16> to vector<1x20x128xbf16>
    tpu.vector_store %arg13[%46, %c0_38, %c0_39], %49 {strides = array<i32>} : memref<2x20x128xbf16, #tpu.memory_space<vmem>>, vector<1x20x128xbf16>,
    %50 = vector.broadcast %3 : vector<20x1xf32> to vector<20x128xf32>
    %51 = arith.mulf %44, %50 : vector<20x128xf32>
    %cst_40 = arith.constant dense<0.000000e+00> : vector<128xf32>
    %52 = vector.multi_reduction <add>, %51, %cst_40 [0] : vector<20x128xf32> to vector<128xf32>
    %53 = vector.shape_cast %52 : vector<128xf32> to vector<1x128xf32>
    %54 = arith.addf %4, %53 : vector<1x128xf32>
    %55 = arith.mulf %51, %44 : vector<20x128xf32>
    %cst_41 = arith.constant dense<0.000000e+00> : vector<128xf32>
    %56 = vector.multi_reduction <add>, %55, %cst_41 [0] : vector<20x128xf32> to vector<128xf32>
    %57 = vector.shape_cast %56 : vector<128xf32> to vector<1x128xf32>
    %58 = arith.addf %5, %57 : vector<1x128xf32>
    %c2_i32_42 = arith.constant 2 : i32
    %59 = arith.muli %arg0, %c2_i32_42 : i32
    %c1_i32 = arith.constant 1 : i32
    %60 = arith.addi %59, %c1_i32 : i32
    %c1_43 = arith.constant 1 : index
    %c0_44 = arith.constant 0 : index
    %c0_45 = arith.constant 0 : index
    %61 = vector.load %arg1[%c1_43, %c0_44, %c0_45] : memref<2x26x128xbf16, #tpu.memory_space<vmem>>, vector<1x26x128xbf16>
    %62 = vector.shape_cast %61 : vector<1x26x128xbf16> to vector<26x128xbf16>
    %c0_46 = arith.constant 0 : index
    %c0_47 = arith.constant 0 : index
    %63 = vector.load %arg2[%c0_46, %c0_47] : memref<128x256xbf16, #tpu.memory_space<vmem>>, vector<128x256xbf16>
    %cst_48 = arith.constant dense<0.000000e+00> : vector<26x256xf32>
    %64 = tpu.matmul %62, %63, %cst_48 {dimension_numbers = #tpu.dot_dimension_numbers<[1], [0], [0], [1], [0, 0, 1, 1], [], []>} : vector<26x128xbf16>, vector<128x256xbf16>, vector<26x256xf32> -> vector<26x256xf32>
    %c0_49 = arith.constant 0 : index
    %c0_50 = arith.constant 0 : index
    %65 = vector.load %arg3[%c0_49, %c0_50] : memref<1x256xf32, #tpu.memory_space<vmem>>, vector<1x256xf32>
    %66 = vector.broadcast %65 : vector<1x256xf32> to vector<26x256xf32>
    %67 = arith.addf %64, %66 : vector<26x256xf32>
    %cst_51 = arith.constant 0.000000e+00 : f32
    %68 = vector.broadcast %cst_51 : f32 to vector<26x256xf32>
    %69 = arith.cmpf oge, %67, %68 : vector<26x256xf32>
    %cst_52 = arith.constant 2.000000e-01 : f32
    %70 = vector.broadcast %cst_52 : f32 to vector<26x256xf32>
    %71 = arith.mulf %70, %67 : vector<26x256xf32>
    %72 = arith.select %69, %67, %71 : vector<26x256xi1>, vector<26x256xf32>
    %c0_53 = arith.constant 0 : index
    %c0_54 = arith.constant 0 : index
    %73 = vector.load %arg4[%c0_53, %c0_54] : memref<26x256xf32, #tpu.memory_space<vmem>>, vector<26x256xf32>
    %74 = arith.mulf %72, %73 : vector<26x256xf32>
    %75 = arith.truncf %74 : vector<26x256xf32> to vector<26x256xbf16>
    %c0_55 = arith.constant 0 : index
    %c0_56 = arith.constant 0 : index
    %76 = vector.load %arg12[%c0_55, %c0_56] : memref<26x256xbf16, #tpu.memory_space<vmem>>, vector<26x256xbf16>
    tpu.vector_store %arg12[%c0_55, %c0_56], %75 {strides = array<i32>} : memref<26x256xbf16, #tpu.memory_space<vmem>>, vector<26x256xbf16>,
    %cst_57 = arith.constant 0.000000e+00 : f32
    %77 = vector.broadcast %cst_57 : f32 to vector<20x128xf32>
    %c0_58 = arith.constant 0 : index
    %c0_59 = arith.constant 0 : index
    %78 = vector.load %arg12[%c0_58, %c0_59] : memref<26x256xbf16, #tpu.memory_space<vmem>>, vector<20x256xbf16>
    %c0_60 = arith.constant 0 : index
    %c0_61 = arith.constant 0 : index
    %c0_62 = arith.constant 0 : index
    %79 = vector.load %arg5[%c0_60, %c0_61, %c0_62] : memref<4x256x128xbf16, #tpu.memory_space<vmem>>, vector<1x256x128xbf16>
    %80 = vector.shape_cast %79 : vector<1x256x128xbf16> to vector<256x128xbf16>
    %cst_63 = arith.constant dense<0.000000e+00> : vector<20x128xf32>
    %81 = tpu.matmul %78, %80, %cst_63 {dimension_numbers = #tpu.dot_dimension_numbers<[1], [0], [0], [1], [0, 0, 1, 1], [], []>} : vector<20x256xbf16>, vector<256x128xbf16>, vector<20x128xf32> -> vector<20x128xf32>
    %82 = arith.addf %77, %81 : vector<20x128xf32>
    %c1_64 = arith.constant 1 : index
    %c0_65 = arith.constant 0 : index
    %83 = vector.load %arg12[%c1_64, %c0_65] : memref<26x256xbf16, #tpu.memory_space<vmem>>, vector<20x256xbf16>
    %c1_66 = arith.constant 1 : index
    %c0_67 = arith.constant 0 : index
    %c0_68 = arith.constant 0 : index
    %84 = vector.load %arg5[%c1_66, %c0_67, %c0_68] : memref<4x256x128xbf16, #tpu.memory_space<vmem>>, vector<1x256x128xbf16>
    %85 = vector.shape_cast %84 : vector<1x256x128xbf16> to vector<256x128xbf16>
    %cst_69 = arith.constant dense<0.000000e+00> : vector<20x128xf32>
    %86 = tpu.matmul %83, %85, %cst_69 {dimension_numbers = #tpu.dot_dimension_numbers<[1], [0], [0], [1], [0, 0, 1, 1], [], []>} : vector<20x256xbf16>, vector<256x128xbf16>, vector<20x128xf32> -> vector<20x128xf32>
    %87 = arith.addf %82, %86 : vector<20x128xf32>
    %c5_70 = arith.constant 5 : index
    %c0_71 = arith.constant 0 : index
    %88 = vector.load %arg12[%c5_70, %c0_71] : memref<26x256xbf16, #tpu.memory_space<vmem>>, vector<20x256xbf16>
    %c2_72 = arith.constant 2 : index
    %c0_73 = arith.constant 0 : index
    %c0_74 = arith.constant 0 : index
    %89 = vector.load %arg5[%c2_72, %c0_73, %c0_74] : memref<4x256x128xbf16, #tpu.memory_space<vmem>>, vector<1x256x128xbf16>
    %90 = vector.shape_cast %89 : vector<1x256x128xbf16> to vector<256x128xbf16>
    %cst_75 = arith.constant dense<0.000000e+00> : vector<20x128xf32>
    %91 = tpu.matmul %88, %90, %cst_75 {dimension_numbers = #tpu.dot_dimension_numbers<[1], [0], [0], [1], [0, 0, 1, 1], [], []>} : vector<20x256xbf16>, vector<256x128xbf16>, vector<20x128xf32> -> vector<20x128xf32>
    %92 = arith.addf %87, %91 : vector<20x128xf32>
    %c6_76 = arith.constant 6 : index
    %c0_77 = arith.constant 0 : index
    %93 = vector.load %arg12[%c6_76, %c0_77] : memref<26x256xbf16, #tpu.memory_space<vmem>>, vector<20x256xbf16>
    %c3_78 = arith.constant 3 : index
    %c0_79 = arith.constant 0 : index
    %c0_80 = arith.constant 0 : index
    %94 = vector.load %arg5[%c3_78, %c0_79, %c0_80] : memref<4x256x128xbf16, #tpu.memory_space<vmem>>, vector<1x256x128xbf16>
    %95 = vector.shape_cast %94 : vector<1x256x128xbf16> to vector<256x128xbf16>
    %cst_81 = arith.constant dense<0.000000e+00> : vector<20x128xf32>
    %96 = tpu.matmul %93, %95, %cst_81 {dimension_numbers = #tpu.dot_dimension_numbers<[1], [0], [0], [1], [0, 0, 1, 1], [], []>} : vector<20x256xbf16>, vector<256x128xbf16>, vector<20x128xf32> -> vector<20x128xf32>
    %97 = arith.addf %92, %96 : vector<20x128xf32>
    %98 = arith.truncf %97 : vector<20x128xf32> to vector<20x128xbf16>
    %99 = arith.index_cast %60 : i32 to index
    %c0_82 = arith.constant 0 : index
    %c0_83 = arith.constant 0 : index
    %100 = vector.load %arg13[%99, %c0_82, %c0_83] : memref<2x20x128xbf16, #tpu.memory_space<vmem>>, vector<1x20x128xbf16>
    %101 = vector.shape_cast %100 : vector<1x20x128xbf16> to vector<20x128xbf16>
    %102 = vector.shape_cast %98 : vector<20x128xbf16> to vector<1x20x128xbf16>
    tpu.vector_store %arg13[%99, %c0_82, %c0_83], %102 {strides = array<i32>} : memref<2x20x128xbf16, #tpu.memory_space<vmem>>, vector<1x20x128xbf16>,
    %103 = vector.broadcast %3 : vector<20x1xf32> to vector<20x128xf32>
    %104 = arith.mulf %97, %103 : vector<20x128xf32>
    %cst_84 = arith.constant dense<0.000000e+00> : vector<128xf32>
    %105 = vector.multi_reduction <add>, %104, %cst_84 [0] : vector<20x128xf32> to vector<128xf32>
    %106 = vector.shape_cast %105 : vector<128xf32> to vector<1x128xf32>
    %107 = arith.addf %54, %106 : vector<1x128xf32>
    %108 = arith.mulf %104, %97 : vector<20x128xf32>
    %cst_85 = arith.constant dense<0.000000e+00> : vector<128xf32>
    %109 = vector.multi_reduction <add>, %108, %cst_85 [0] : vector<20x128xf32> to vector<128xf32>
    %110 = vector.shape_cast %109 : vector<128xf32> to vector<1x128xf32>
    %111 = arith.addf %58, %110 : vector<1x128xf32>
    %c0_86 = arith.constant 0 : index
    %c0_87 = arith.constant 0 : index
    %112 = vector.load %arg14[%c0_86, %c0_87] : memref<1x128xf32, #tpu.memory_space<vmem>>, vector<1x128xf32>
    %113 = arith.addf %112, %107 : vector<1x128xf32>
    %c0_88 = arith.constant 0 : index
    %c0_89 = arith.constant 0 : index
    %114 = vector.load %arg14[%c0_88, %c0_89] : memref<1x128xf32, #tpu.memory_space<vmem>>, vector<1x128xf32>
    tpu.vector_store %arg14[%c0_88, %c0_89], %113 {strides = array<i32>} : memref<1x128xf32, #tpu.memory_space<vmem>>, vector<1x128xf32>,
    %c0_90 = arith.constant 0 : index
    %c0_91 = arith.constant 0 : index
    %115 = vector.load %arg15[%c0_90, %c0_91] : memref<1x128xf32, #tpu.memory_space<vmem>>, vector<1x128xf32>
    %116 = arith.addf %115, %111 : vector<1x128xf32>
    %c0_92 = arith.constant 0 : index
    %c0_93 = arith.constant 0 : index
    %117 = vector.load %arg15[%c0_92, %c0_93] : memref<1x128xf32, #tpu.memory_space<vmem>>, vector<1x128xf32>
    tpu.vector_store %arg15[%c0_92, %c0_93], %116 {strides = array<i32>} : memref<1x128xf32, #tpu.memory_space<vmem>>, vector<1x128xf32>,
    %c0_i32_94 = arith.constant 0 : i32
    %118 = arith.cmpi eq, %arg0, %c0_i32_94 : i32
    %119 = arith.extui %118 : i1 to i32
    %c0_i32_95 = arith.constant 0 : i32
    %120 = arith.cmpi ne, %119, %c0_i32_95 : i32
    scf.if %120 {
      %c0_96 = arith.constant 0 : index
      %c0_97 = arith.constant 0 : index
      %121 = vector.load %arg14[%c0_96, %c0_97] : memref<1x128xf32, #tpu.memory_space<vmem>>, vector<1x128xf32>
      %cst_98 = arith.constant 3.125000e-02 : f32
      %122 = vector.broadcast %cst_98 : f32 to vector<1x128xf32>
      %123 = arith.mulf %121, %122 : vector<1x128xf32>
      %c0_99 = arith.constant 0 : index
      %c0_100 = arith.constant 0 : index
      %124 = vector.load %arg15[%c0_99, %c0_100] : memref<1x128xf32, #tpu.memory_space<vmem>>, vector<1x128xf32>
      %cst_101 = arith.constant 3.125000e-02 : f32
      %125 = vector.broadcast %cst_101 : f32 to vector<1x128xf32>
      %126 = arith.mulf %124, %125 : vector<1x128xf32>
      %127 = arith.mulf %123, %123 : vector<1x128xf32>
      %128 = arith.subf %126, %127 : vector<1x128xf32>
      %c0_102 = arith.constant 0 : index
      %c0_103 = arith.constant 0 : index
      %129 = vector.load %arg7[%c0_102, %c0_103] : memref<1x128xf32, #tpu.memory_space<vmem>>, vector<1x128xf32>
      %cst_104 = arith.constant 9.99999974E-6 : f32
      %130 = vector.broadcast %cst_104 : f32 to vector<1x128xf32>
      %131 = arith.addf %128, %130 : vector<1x128xf32>
      %132 = math.rsqrt %131 : vector<1x128xf32>
      %133 = arith.mulf %129, %132 : vector<1x128xf32>
      %c0_105 = arith.constant 0 : index
      %c0_106 = arith.constant 0 : index
      %134 = vector.load %arg8[%c0_105, %c0_106] : memref<1x128xf32, #tpu.memory_space<vmem>>, vector<1x128xf32>
      %135 = arith.mulf %123, %133 : vector<1x128xf32>
      %136 = arith.subf %134, %135 : vector<1x128xf32>
      %c0_107 = arith.constant 0 : index
      %c0_108 = arith.constant 0 : index
      %137 = vector.load %arg9[%c0_107, %c0_108] : memref<20x128xf32, #tpu.memory_space<vmem>>, vector<20x128xf32>
      %c0_109 = arith.constant 0 : index
      %c0_110 = arith.constant 0 : index
      %c0_111 = arith.constant 0 : index
      %138 = vector.load %arg13[%c0_109, %c0_110, %c0_111] : memref<2x20x128xbf16, #tpu.memory_space<vmem>>, vector<1x20x128xbf16>
      %139 = vector.shape_cast %138 : vector<1x20x128xbf16> to vector<20x128xbf16>
      %140 = arith.extf %139 : vector<20x128xbf16> to vector<20x128xf32>
      %141 = vector.broadcast %133 : vector<1x128xf32> to vector<20x128xf32>
      %142 = arith.mulf %140, %141 : vector<20x128xf32>
      %143 = vector.broadcast %136 : vector<1x128xf32> to vector<20x128xf32>
      %144 = arith.addf %142, %143 : vector<20x128xf32>
      %cst_112 = arith.constant 0.000000e+00 : f32
      %145 = vector.broadcast %cst_112 : f32 to vector<20x128xf32>
      %146 = arith.cmpf oge, %144, %145 : vector<20x128xf32>
      %cst_113 = arith.constant 2.000000e-01 : f32
      %147 = vector.broadcast %cst_113 : f32 to vector<20x128xf32>
      %148 = arith.mulf %147, %144 : vector<20x128xf32>
      %149 = arith.select %146, %144, %148 : vector<20x128xi1>, vector<20x128xf32>
      %150 = arith.mulf %149, %137 : vector<20x128xf32>
      %cst_114 = arith.constant dense<0.000000e+00> : vector<128xf32>
      %151 = vector.multi_reduction <add>, %150, %cst_114 [0] : vector<20x128xf32> to vector<128xf32>
      %152 = vector.shape_cast %151 : vector<128xf32> to vector<1x128xf32>
      %c1_115 = arith.constant 1 : index
      %c0_116 = arith.constant 0 : index
      %c0_117 = arith.constant 0 : index
      %153 = vector.load %arg13[%c1_115, %c0_116, %c0_117] : memref<2x20x128xbf16, #tpu.memory_space<vmem>>, vector<1x20x128xbf16>
      %154 = vector.shape_cast %153 : vector<1x20x128xbf16> to vector<20x128xbf16>
      %155 = arith.extf %154 : vector<20x128xbf16> to vector<20x128xf32>
      %156 = vector.broadcast %133 : vector<1x128xf32> to vector<20x128xf32>
      %157 = arith.mulf %155, %156 : vector<20x128xf32>
      %158 = vector.broadcast %136 : vector<1x128xf32> to vector<20x128xf32>
      %159 = arith.addf %157, %158 : vector<20x128xf32>
      %cst_118 = arith.constant 0.000000e+00 : f32
      %160 = vector.broadcast %cst_118 : f32 to vector<20x128xf32>
      %161 = arith.cmpf oge, %159, %160 : vector<20x128xf32>
      %cst_119 = arith.constant 2.000000e-01 : f32
      %162 = vector.broadcast %cst_119 : f32 to vector<20x128xf32>
      %163 = arith.mulf %162, %159 : vector<20x128xf32>
      %164 = arith.select %161, %159, %163 : vector<20x128xi1>, vector<20x128xf32>
      %165 = arith.mulf %164, %137 : vector<20x128xf32>
      %cst_120 = arith.constant dense<0.000000e+00> : vector<128xf32>
      %166 = vector.multi_reduction <add>, %165, %cst_120 [0] : vector<20x128xf32> to vector<128xf32>
      %167 = vector.shape_cast %166 : vector<128xf32> to vector<1x128xf32>
      %168 = tpu.concatenate %152, %167 in 0 : vector<1x128xf32>, vector<1x128xf32> -> vector<2x128xf32>
      %cst_121 = arith.constant dense<0.000000e+00> : vector<2xf32>
      %169 = vector.multi_reduction <add>, %168, %cst_121 [1] : vector<2x128xf32> to vector<2xf32>
      %170 = vector.shape_cast %169 : vector<2xf32> to vector<2x1xf32>
      %c0_122 = arith.constant 0 : index
      %c0_123 = arith.constant 0 : index
      %171 = vector.load %arg10[%c0_122, %c0_123] : memref<1x1xf32, #tpu.memory_space<vmem>>, vector<1x1xf32>
      %172 = vector.broadcast %171 : vector<1x1xf32> to vector<2x1xf32>
      %173 = arith.addf %170, %172 : vector<2x1xf32>
      %174 = arith.negf %173 : vector<2x1xf32>
      %175 = math.exp %174 : vector<2x1xf32>
      %cst_124 = arith.constant 1.000000e+00 : f32
      %176 = vector.broadcast %cst_124 : f32 to vector<2x1xf32>
      %177 = arith.addf %176, %175 : vector<2x1xf32>
      %178 = arith.divf %176, %177 : vector<2x1xf32>
      %c0_125 = arith.constant 0 : index
      %c0_126 = arith.constant 0 : index
      %179 = vector.load %arg11[%c0_125, %c0_126] : memref<2x1xf32, #tpu.memory_space<vmem>>, vector<2x1xf32>
      tpu.vector_store %arg11[%c0_125, %c0_126], %178 {strides = array<i32>} : memref<2x1xf32, #tpu.memory_space<vmem>>, vector<2x1xf32>,
    } else {
    }
    return
  }
  func.func @transform_0(%arg0: i32) -> (i32, i32, i32) {
    %c0_i32 = arith.constant 0 : i32
    %c0_i32_0 = arith.constant 0 : i32
    %c0_i32_1 = arith.constant 0 : i32
    return %arg0, %c0_i32, %c0_i32_0 : i32, i32, i32
  }
  func.func @transform_1(%arg0: i32) -> (i32, i32) {
    %c0_i32 = arith.constant 0 : i32
    %c0_i32_0 = arith.constant 0 : i32
    %c0_i32_1 = arith.constant 0 : i32
    return %c0_i32, %c0_i32_0 : i32, i32
  }
  func.func @transform_2(%arg0: i32) -> (i32, i32) {
    %c0_i32 = arith.constant 0 : i32
    %c0_i32_0 = arith.constant 0 : i32
    %c0_i32_1 = arith.constant 0 : i32
    return %c0_i32, %c0_i32_0 : i32, i32
  }
  func.func @transform_3(%arg0: i32) -> (i32, i32) {
    %c0_i32 = arith.constant 0 : i32
    %c0_i32_0 = arith.constant 0 : i32
    %c0_i32_1 = arith.constant 0 : i32
    return %c0_i32, %c0_i32_0 : i32, i32
  }
  func.func @transform_4(%arg0: i32) -> (i32, i32, i32) {
    %c0_i32 = arith.constant 0 : i32
    %c0_i32_0 = arith.constant 0 : i32
    %c0_i32_1 = arith.constant 0 : i32
    %c0_i32_2 = arith.constant 0 : i32
    return %c0_i32, %c0_i32_0, %c0_i32_1 : i32, i32, i32
  }
  func.func @transform_5(%arg0: i32) -> (i32, i32) {
    %c0_i32 = arith.constant 0 : i32
    %c0_i32_0 = arith.constant 0 : i32
    %c0_i32_1 = arith.constant 0 : i32
    return %c0_i32, %c0_i32_0 : i32, i32
  }
  func.func @transform_6(%arg0: i32) -> (i32, i32) {
    %c0_i32 = arith.constant 0 : i32
    %c0_i32_0 = arith.constant 0 : i32
    %c0_i32_1 = arith.constant 0 : i32
    return %c0_i32, %c0_i32_0 : i32, i32
  }
  func.func @transform_7(%arg0: i32) -> (i32, i32) {
    %c0_i32 = arith.constant 0 : i32
    %c0_i32_0 = arith.constant 0 : i32
    %c0_i32_1 = arith.constant 0 : i32
    return %c0_i32, %c0_i32_0 : i32, i32
  }
  func.func @transform_8(%arg0: i32) -> (i32, i32) {
    %c0_i32 = arith.constant 0 : i32
    %c0_i32_0 = arith.constant 0 : i32
    %c0_i32_1 = arith.constant 0 : i32
    return %c0_i32, %c0_i32_0 : i32, i32
  }
  func.func @transform_9(%arg0: i32) -> (i32, i32) {
    %c0_i32 = arith.constant 0 : i32
    %c0_i32_0 = arith.constant 0 : i32
    %c0_i32_1 = arith.constant 0 : i32
    return %c0_i32, %c0_i32_0 : i32, i32
  }
  func.func @transform_10(%arg0: i32) -> (i32, i32) {
    %c0_i32 = arith.constant 0 : i32
    %c0_i32_0 = arith.constant 0 : i32
    %c0_i32_1 = arith.constant 0 : i32
    return %c0_i32, %c0_i32_0 : i32, i32
  }
}

</mosaic_0001>

<bundles_post_ra>
// kernel: tile.18
= control target key start
LH: loop header
LB: loop body
LE: loop exit
PB: predicated region body
PF: predicated region fallthrough
CT: control target
= control target key end

     0   :  { %s22_s0 = inlined_call_operand.vmem [shape: f32[5], index: 0, kind: input, shape index: {}]   ;;  %s23_s1 = inlined_call_operand.vmem [shape: f32[4,5], index: 1, kind: output, shape index: {}]  }
   0x1   :  { %v4_v0 = vld [vmem:[%s22_s0] ss:$0 sm:$0xff] }
   0x2   :  { %5 = vst [vmem:[%s23_s1] sm:$0xf] %v4_v0 }

// kernel: tile.0
= control target key start
LH: loop header
LB: loop body
LE: loop exit
PB: predicated region body
PF: predicated region fallthrough
CT: control target
= control target key end

     0   :  { %s42_s8 = smov 127   ;;  %vm7_vm0 = vcmask 7168   ;;  %s43_s11 = smov 124   ;;  %s78_s0 = inlined_call_operand.vmem [shape: f32[4,5], index: 0, kind: input, shape index: {}]   ;;  %s79_s1 = inlined_call_operand.vmem [shape: f32[20,1], index: 1, kind: output, shape index: {}]  }
   0x1   :  { %v4_v0 = vld [vmem:[%s78_s0] sm:$0xf]  ;;  %s41_s0 = smov 125   ;;  %s44_s12 = smov 126  }
   0x2   :  { %5 = vst [vmem:[#allocation0] sm:$0xf] %v4_v0 }
   0x9   :  { %v21_v1 = vld [vmem:[#allocation0] sm:$0xf]  }
   0xa   :  { %v9_v2 = vld [vmem:[#allocation0] sm:$0xf]   ;;  %22 = vrot.lane.b32.xlu1 %v21_v1, %s41_s0 }
   0xb   :  { %10 = vrot.lane.b32.xlu0 %v9_v2, %s42_s8  ;;  %v6_v3 = vld [vmem:[#allocation0] sm:$0xf]  }
   0xc   :  { %v27_v4 = vld [vmem:[#allocation0] sm:$0xf]   ;;  %8 = vst.msk [vmem:[%s79_s1] ss:$5 sm:$0xf] %vm7_vm0, %v6_v3  }
   0xd   :  { %v15_v5 = vld [vmem:[#allocation0] sm:$0xf]  }
   0xe   :  { %28 = vrot.lane.b32.xlu1 %v27_v4, %s43_s11 }
   0xf   :  { %16 = vrot.lane.b32.xlu0 %v15_v5, %s44_s12 }
  0x7c   :  { %v23_v6 = vpop.permute.xlu1 %22  }
  0x7d   :  { %v11_v7 = vpop.permute.xlu0 %10   ;;  %35 = vst.msk [vmem:[%s79_s1 + $0x3] ss:$5 sm:$0xf] %vm7_vm0, %v23_v6  }
  0x7e   :  { %33 = vst.msk [vmem:[%s79_s1 + $0x1] ss:$5 sm:$0xf] %vm7_vm0, %v11_v7  }
  0x80   :  { %v29_v8 = vpop.permute.xlu1 %28  }
  0x81   :  { %v17_v9 = vpop.permute.xlu0 %16   ;;  %36 = vst.msk [vmem:[%s79_s1 + $0x4] ss:$5 sm:$0xf] %vm7_vm0, %v29_v8  }
  0x82   :  { %34 = vst.msk [vmem:[%s79_s1 + $0x2] ss:$5 sm:$0xf] %vm7_vm0, %v17_v9  }

// kernel: tile.13
= control target key start
LH: loop header
LB: loop body
LE: loop exit
PB: predicated region body
PF: predicated region fallthrough
CT: control target
= control target key end

     0   :  { %s22_s0 = inlined_call_operand.vmem [shape: f32[64], index: 0, kind: input, shape index: {}]   ;;  %s23_s1 = inlined_call_operand.vmem [shape: f32[4,64], index: 1, kind: output, shape index: {}]  }
   0x1   :  { %v4_v0 = vld [vmem:[%s22_s0] ss:$0 sm:$0xff] }
   0x2   :  { %5 = vst [vmem:[%s23_s1] sm:$0xf] %v4_v0 }

// kernel: tile.14
= control target key start
LH: loop header
LB: loop body
LE: loop exit
PB: predicated region body
PF: predicated region fallthrough
CT: control target
= control target key end

     0   :  { %s6_s8 = smov 3  ;;  %vm8_vm0 = vcmask 523264   ;;  %s30_s9 = smov 64   ;;  %vm15_vm1 = vcmask 1048064   ;;  %s50_s0 = inlined_call_operand.vmem [shape: f32[4,64], index: 0, kind: input, shape index: {}]   ;;  %s51_s1 = inlined_call_operand.vmem [shape: f32[1,256], index: 1, kind: output, shape index: {}]  }
   0x1   :  { %v4_v0 = vld [vmem:[%s50_s0] sm:$0xf]  ;;  %s11_s0 = smov 3 }
   0x2   :  { %5 = vst [vmem:[#allocation1] sm:$0xf] %v4_v0 }
   0x9   :  { %v12_v1 = vld [vmem:[#allocation1 + $0x1] ss:$2 sm:%s11_s0]   ;;  %v7_v2 = vld [vmem:[#allocation1] ss:$2 sm:%s6_s8]  }
   0xa   :  { %13 = vrot.lane.b32.xlu0 %v12_v1, %s30_s9  ;;  %9 = vst.msk [vmem:[#allocation0] ss:$8 sm:$0x3] %vm8_vm0, %v7_v2  }
  0x7c   :  { %v14_v3 = vpop.permute.xlu0 %13  }
  0x7d   :  { %16 = vst.msk [vmem:[#allocation0] ss:$8 sm:$0x3] %vm15_vm1, %v14_v3  }
  0x84   :  { %v20_v4 = vld [vmem:[#allocation0] sm:$0x1]  ;;  %v24_v5 = vld [vmem:[#allocation0 + $0x8] sm:$0x1] }
  0x85   :  { %22 = vst [vmem:[%s51_s1] sm:$0x1] %v20_v4  ;;  %28 = vst [vmem:[%s51_s1 + $0x1] sm:$0x1] %v24_v5 }

// kernel: discriminator_forward.1
= control target key start
LH: loop header
LB: loop body
LE: loop exit
PB: predicated region body
PF: predicated region fallthrough
CT: control target
= control target key end

     0   :  { %v3312_v1 = vmov 0   ;;  %v70_v56 = vlaneseq  ;;  %vm375_vm8 = vsmask.f32 7424  ;;  %vm985_vm9 = vcmask 1044480   ;;  %s4059_s1 = inlined_call_operand.vmem [shape: bf16[128,256], index: 1, kind: input, shape index: {}]   ;;  %s4060_s0 = inlined_call_operand.vmem [shape: bf16[2,26,128], index: 0, kind: input, shape index: {}]   ;;  %s4061_s4 = inlined_call_operand.vmem [shape: bf16[4,256,128], index: 4, kind: input, shape index: {}]   ;;  %s4062_s5 = inlined_call_operand.vmem [shape: f32[20,1], index: 5, kind: input, shape index: {}]   ;;  %s4063_s2 = inlined_call_operand.vmem [shape: f32[1,256], index: 2, kind: input, shape index: {}]   ;;  %s4064_s3 = inlined_call_operand.vmem [shape: f32[26,256], index: 3, kind: input, shape index: {}]   ;;  %s4065_s9 = inlined_call_operand.<no memory space> [shape: f32[1,1], index: 9, kind: input, shape index: {}]   ;;  %s4066_s6 = inlined_call_operand.vmem [shape: f32[1,128], index: 6, kind: input, shape index: {}]   ;;  %s4067_s7 = inlined_call_operand.vmem [shape: f32[1,128], index: 7, kind: input, shape index: {}]   ;;  %s4068_s8 = inlined_call_operand.vmem [shape: f32[20,128], index: 8, kind: input, shape index: {}]   ;;  %s4069_s10 = inlined_call_operand.vmem [shape: f32[2,1], index: 10, kind: output, shape index: {}]  }
   0x1   :  { %v3122_v0 = vld [vmem:[%s4059_s1 + $0x4] ss:$8 sps:$4 sm:$0xff]   ;;  %204 = vmatprep.mubr.bf16.mxu0 %v3312_v1  ;;  %3120 = vset.pattern.permute.xlu0 %v3312_v1  ;;  %v3124_v2 = vld [vmem:[%s4059_s1] ss:$8 sps:$4 sm:$0xff]   ;;  %v3125_v3 = vld [vmem:[%s4059_s1 + $0x14] ss:$8 sps:$4 sm:$0xff]  }
   0x2   :  { %3121 = vset.pattern.permute.xlu1 %v3312_v1  ;;  %172 = vmatprep.subr.bf16.mxu0 %v3122_v0  ;;  %v3127_v4 = vld [vmem:[%s4059_s1 + $0x10] ss:$8 sps:$4 sm:$0xff]   ;;  %v3128_v5 = vld [vmem:[%s4059_s1 + $0x24] ss:$8 sps:$4 sm:$0xff]   ;;  %v3130_v6 = vld [vmem:[%s4059_s1 + $0x20] ss:$8 sps:$4 sm:$0xff]  }
   0x3   :  { %173 = vmatpush1.bf16.msra.mxu0 %v3124_v2  ;;  %v3131_v7 = vld [vmem:[%s4059_s1 + $0x34] ss:$8 sps:$4 sm:$0xff]   ;;  %v3133_v8 = vld [vmem:[%s4059_s1 + $0x30] ss:$8 sps:$4 sm:$0xff]   ;;  %v3134_v9 = vld [vmem:[%s4059_s1 + $0x44] ss:$8 sps:$4 sm:$0xff]  }
   0x4   :  { %174 = vmatprep.subr.bf16.mxu0 %v3125_v3  ;;  %v3136_v10 = vld [vmem:[%s4059_s1 + $0x40] ss:$8 sps:$4 sm:$0xff]   ;;  %v3137_v11 = vld [vmem:[%s4059_s1 + $0x54] ss:$8 sps:$4 sm:$0xff]   ;;  %v3139_v12 = vld [vmem:[%s4059_s1 + $0x50] ss:$8 sps:$4 sm:$0xff]  }
   0x5   :  { %v3140_v13 = vld [vmem:[%s4059_s1 + $0x64] ss:$8 sps:$4 sm:$0xff]   ;;  %v3142_v14 = vld [vmem:[%s4059_s1 + $0x60] ss:$8 sps:$4 sm:$0xff]   ;;  %v3143_v15 = vld [vmem:[%s4059_s1 + $0x74] ss:$8 sps:$4 sm:$0xff]  }
   0x6   :  { %v3145_v16 = vld [vmem:[%s4059_s1 + $0x70] ss:$8 sps:$4 sm:$0xff]   ;;  %v3148_v17 = vld [vmem:[%s4061_s4 + $0x40] sm:$0xff]   ;;  %v3150_v20 = vld [vmem:[%s4061_s4 + $0x48] sm:$0xff]   ;;  %v3538_v57 = vshrl.u32 %v70_v56, 7  ;;  %vm1181_vm11 = vcmask 1043456  }
   0x7   :  { %175 = vmatpush1.bf16.msra.mxu0 %v3127_v4  ;;  %v3146_v18 = vld [vmem:[%s4060_s0] sm:$0xff]   ;;  %v3151_v21 = vld [vmem:[%s4061_s4 + $0x8] sm:$0xff]   ;;  %v3152_v22 = vld [vmem:[%s4061_s4 + $0x50] sm:$0xff]   ;;  %vm760_vm10 = vsmask.f32 5376 }
   0x8   :  { %176 = vmatprep.subr.bf16.mxu0 %v3128_v5  ;;  %v3149_v19 = vld [vmem:[%s4061_s4] sm:$0xff]   ;;  %v3147_v23 = vld [vmem:[%s4060_s0 + $0x8] sm:$0x1f]   ;;  %v3153_v24 = vld [vmem:[%s4061_s4 + $0x10] sm:$0xff]   ;;  %v3541_v58 = vsub.s32 0, %v3538_v57  ;;  %v76_v60 = vsub.s32 1, %v3538_v57 }
   0x9   :  { %v3156_v25 = vld [vmem:[%s4061_s4 + $0x58] sm:$0xff]   ;;  %v3160_v27 = vld [vmem:[%s4061_s4 + $0x60] sm:$0xff]   ;;  %v3164_v31 = vld [vmem:[%s4061_s4 + $0x68] sm:$0xff]  }
   0xa   :  { %v3157_v26 = vld [vmem:[%s4061_s4 + $0x18] sm:$0xff]   ;;  %v3161_v28 = vld [vmem:[%s4061_s4 + $0x20] sm:$0xff]   ;;  %v3165_v32 = vld [vmem:[%s4061_s4 + $0x28] sm:$0xff]  }
   0xb   :  { %177 = vmatpush1.bf16.msra.mxu0 %v3130_v6  ;;  %v3154_v29 = vld [vmem:[%s4061_s4 + $0xc0] sm:$0xff]   ;;  %v3158_v33 = vld [vmem:[%s4061_s4 + $0xc8] sm:$0xff]   ;;  %v3168_v35 = vld [vmem:[%s4061_s4 + $0x70] sm:$0xff]  }
   0xc   :  { %178 = vmatprep.subr.bf16.mxu0 %v3131_v7  ;;  %v3155_v30 = vld [vmem:[%s4061_s4 + $0x80] sm:$0xff]   ;;  %2894 = vmatprep.subr.bf16.mxu1 %v3154_v29  ;;  %v3159_v34 = vld [vmem:[%s4061_s4 + $0x88] sm:$0xff]   ;;  %v3169_v36 = vld [vmem:[%s4061_s4 + $0x30] sm:$0xff]  }
   0xd   :  { %2895 = vmatpush3.bf16.msra.mxu1 %v3155_v30  ;;  %v3162_v37 = vld [vmem:[%s4061_s4 + $0xd0] sm:$0xff]   ;;  %v3172_v39 = vld [vmem:[%s4061_s4 + $0x78] sm:$0xff]   ;;  %v3176_v43 = vld [vmem:[%s4061_s4 + $0x1c0] sm:$0xff]  }
   0xe   :  { %2896 = vmatprep.subr.bf16.mxu1 %v3158_v33  ;;  %v3163_v38 = vld [vmem:[%s4061_s4 + $0x90] sm:$0xff]   ;;  %v3173_v40 = vld [vmem:[%s4061_s4 + $0x38] sm:$0xff]   ;;  %v3170_v44 = vld [vmem:[%s4061_s4 + $0xe0] sm:$0xff]  }
   0xf   :  { %179 = vmatpush1.bf16.msra.mxu0 %v3133_v8  ;;  %v3166_v41 = vld [vmem:[%s4061_s4 + $0xd8] sm:$0xff]   ;;  %v3171_v45 = vld [vmem:[%s4061_s4 + $0xa0] sm:$0xff]   ;;  %v3174_v46 = vld [vmem:[%s4061_s4 + $0xe8] sm:$0xff]  }
  0x10   :  { %180 = vmatprep.subr.bf16.mxu0 %v3134_v9  ;;  %v3167_v42 = vld [vmem:[%s4061_s4 + $0x98] sm:$0xff]   ;;  %v3175_v47 = vld [vmem:[%s4061_s4 + $0xa8] sm:$0xff]   ;;  %v3178_v48 = vld [vmem:[%s4061_s4 + $0xf0] sm:$0xff]  }
  0x11   :  { %2897 = vmatpush3.bf16.msra.mxu1 %v3159_v34  ;;  %v3179_v49 = vld [vmem:[%s4061_s4 + $0xb0] sm:$0xff]   ;;  %v3183_v50 = vld [vmem:[%s4061_s4 + $0xf8] sm:$0xff]   ;;  %v3189_v52 = vld [vmem:[%s4061_s4 + $0x140] sm:$0xff]  }
  0x12   :  { %2898 = vmatprep.subr.bf16.mxu1 %v3162_v37  ;;  %v3184_v51 = vld [vmem:[%s4061_s4 + $0xb8] sm:$0xff]   ;;  %v44_v53 = vld [vmem:[%s4062_s5] sm:$0xff]  ;;  %v46_v54 = vld [vmem:[%s4062_s5 + $0x10] sm:$0xf] }
  0x13   :  { %181 = vmatpush1.bf16.msra.mxu0 %v3136_v10  ;;  %1164 = vperm.xlu0 %3120, %v44_v53   ;;  %v45_v55 = vld [vmem:[%s4062_s5 + $0x8] sm:$0xff]  ;;  %v68_v59 = vld [vmem:[%s4063_s2] sm:$0x3] }
  0x14   :  { %182 = vmatprep.subr.bf16.mxu0 %v3137_v11  ;;  %1174 = vperm.xlu1 %3121, %v46_v54   ;;  %v73_v61 = vrot.slane %v68_v59, %v3541_v58  ;;  %v77_v62 = vrot.slane %v68_v59, %v76_v60  ;;  %v249_v6 = vld [vmem:[%s4064_s3] sm:$0xff]  ;;  %v250_v10 = vld [vmem:[%s4064_s3 + $0x8] sm:$0xff] }
  0x15   :  { %2899 = vmatpush3.bf16.msra.mxu1 %v3163_v38  ;;  %v1408_v57 = vld [vmem:[%s4064_s3 + $0x8] sm:$0xff] }
  0x16   :  { %2900 = vmatprep.subr.bf16.mxu1 %v3166_v41 }
  0x17   :  { %183 = vmatpush1.bf16.msra.mxu0 %v3139_v12  ;;  %1169 = vperm.xlu0 %3120, %v45_v55  }
  0x18   :  { %184 = vmatprep.subr.bf16.mxu0 %v3140_v13 }
  0x19   :  { %2901 = vmatpush3.bf16.msra.mxu1 %v3167_v42 }
  0x1a   :  { %2902 = vmatprep.subr.bf16.mxu1 %v3170_v44 }
  0x1b   :  { %185 = vmatpush1.bf16.msra.mxu0 %v3142_v14  ;;  %v251_v14 = vld [vmem:[%s4064_s3 + $0x10] sm:$0xff] }
  0x1c   :  { %186 = vmatprep.subr.bf16.mxu0 %v3143_v15 }
  0x1d   :  { %2903 = vmatpush3.bf16.msra.mxu1 %v3171_v45  ;;  %v256_v45 = vld [vmem:[%s4064_s3 + $0x38] sm:$0x3] }
  0x1e   :  { %2904 = vmatprep.subr.bf16.mxu1 %v3174_v46 }
  0x1f   :  { %187 = vmatpush1.bf16.msra.mxu0 %v3145_v16 }
  0x20   :  { %2922 = vmatprep.subr.bf16.mxu0 %v3148_v17 }
  0x21   :  { %2905 = vmatpush3.bf16.msra.mxu1 %v3175_v47 }
  0x22   :  { %205 = vmatmul.mubr.bf16.vlgmr.msra.gmra.mrb[0].mxu0 %v3146_v18  ;;  %2906 = vmatprep.subr.bf16.mxu1 %v3178_v48  ;;  %v252_v18 = vld [vmem:[%s4064_s3 + $0x18] sm:$0xff] }
  0x23   :  { %214 = vmatprep.mubr.bf16.mxu0 %v3312_v1  ;;  %2923 = vmatpush3.bf16.msra.mxu0 %v3149_v19 }
  0x24   :  { %2924 = vmatprep.subr.bf16.mxu0 %v3150_v20 }
  0x25   :  { %2907 = vmatpush3.bf16.msra.mxu1 %v3179_v49  ;;  %v3177_v49 = vld [vmem:[%s4061_s4 + $0x180] sm:$0xff]  }
  0x26   :  { %2908 = vmatprep.subr.bf16.mxu1 %v3183_v50 }
  0x27   :  { %2925 = vmatpush3.bf16.msra.mxu0 %v3151_v21 }
  0x28   :  { %2926 = vmatprep.subr.bf16.mxu0 %v3152_v22 }
  0x29   :  { %2909 = vmatpush3.bf16.msra.mxu1 %v3184_v51 }
  0x2a   :  { %215 = vmatmul.mubr.bf16.gmra.mrb[4].mxu0 %v3147_v23  ;;  %2950 = vmatprep.subr.bf16.mxu1 %v3189_v52  ;;  %v3180_v52 = vld [vmem:[%s4061_s4 + $0x1c8] sm:$0xff]  }
  0x2b   :  { %2927 = vmatpush3.bf16.msra.mxu0 %v3153_v24 }
  0x2c   :  { %2928 = vmatprep.subr.bf16.mxu0 %v3156_v25 }
  0x2f   :  { %2929 = vmatpush3.bf16.msra.mxu0 %v3157_v26 }
  0x30   :  { %2930 = vmatprep.subr.bf16.mxu0 %v3160_v27 }
  0x33   :  { %2931 = vmatpush3.bf16.msra.mxu0 %v3161_v28 }
  0x34   :  { %2932 = vmatprep.subr.bf16.mxu0 %v3164_v31 }
  0x37   :  { %2933 = vmatpush3.bf16.msra.mxu0 %v3165_v32  ;;  %v253_v32 = vld [vmem:[%s4064_s3 + $0x20] sm:$0xff] }
  0x38   :  { %2934 = vmatprep.subr.bf16.mxu0 %v3168_v35 }
  0x3b   :  { %2935 = vmatpush3.bf16.msra.mxu0 %v3169_v36  ;;  %v254_v36 = vld [vmem:[%s4064_s3 + $0x28] sm:$0xff] }
  0x3c   :  { %2936 = vmatprep.subr.bf16.mxu0 %v3172_v39 }
  0x3f   :  { %2937 = vmatpush3.bf16.msra.mxu0 %v3173_v40  ;;  %v255_v40 = vld [vmem:[%s4064_s3 + $0x30] sm:$0x3] }
  0x40   :  { %2978 = vmatprep.subr.bf16.mxu0 %v3176_v43 }
  0xf5   :  { %v206_v63 = vpop.f32.mrb[0].mxu0 }
  0xf6   :  { %v207_v0 = vadd.f32 %v206_v63, %v73_v61  ;;  %v208_v2 = vpop.f32.mrb[1].mxu0 }
  0xf7   :  { %v209_v3 = vadd.f32 %v208_v2, %v77_v62  ;;  %v210_v4 = vpop.f32.mrb[2].mxu0 }
  0xf8   :  { %vm225_vm0 = vcmp.ge.f32.partialorder %v207_v0, 0.0  ;;  %v233_v5 = vmul.f32 0.2, %v207_v0  ;;  %v211_v7 = vadd.f32 %v210_v4, %v73_v61  ;;  %v212_v8 = vpop.f32.mrb[3].mxu0 }
  0xf9   :  { %vm226_vm1 = vcmp.ge.f32.partialorder %v209_v3, 0.0  ;;  %v234_v9 = vmul.f32 0.2, %v209_v3  ;;  %v213_v11 = vadd.f32 %v212_v8, %v77_v62 }
  0xfa   :  { %v241_v12 = vsel %vm225_vm0, %v207_v0, %v233_v5  ;;  %vm227_vm2 = vcmp.ge.f32.partialorder %v211_v7, 0.0  ;;  %v235_v13 = vmul.f32 0.2, %v211_v7  ;;  %v3187_v5 = vld [vmem:[%s4061_s4 + $0x190] sm:$0xff]  }
  0xfb   :  { %v257_v15 = vmul.f32 %v249_v6, %v241_v12  ;;  %v242_v16 = vsel %vm226_vm1, %v209_v3, %v234_v9  ;;  %vm228_vm3 = vcmp.ge.f32.partialorder %v213_v11, 0.0  ;;  %v236_v17 = vmul.f32 0.2, %v213_v11  ;;  %v3192_v9 = vld [vmem:[%s4061_s4 + $0x1d8] sm:$0xff]  }
  0xfc   :  { %v258_v19 = vmul.f32 %v250_v10, %v242_v16  ;;  %v243_v20 = vsel %vm227_vm2, %v211_v7, %v235_v13 }
  0xfd   :  { %v259_v21 = vmul.f32 %v251_v14, %v243_v20  ;;  %v244_v22 = vsel %vm228_vm3, %v213_v11, %v236_v17  ;;  %v216_v23 = vpop.f32.mrb[4].mxu0 }
  0xfe   :  { %v2871_v24 = vpack.c.bf16 %v258_v19, %v257_v15  ;;  %v260_v25 = vmul.f32 %v252_v18, %v244_v22  ;;  %v217_v26 = vadd.f32 %v216_v23, %v73_v61  ;;  %v218_v27 = vpop.f32.mrb[5].mxu0  ;;  %v3193_v23 = vld [vmem:[%s4061_s4 + $0x198] sm:$0xff]  }
  0xff   :  { %v219_v28 = vadd.f32 %v218_v27, %v77_v62  ;;  %v220_v29 = vpop.f32.mrb[6].mxu0  ;;  %v3308_v41 = vpack.c.bf16 %v259_v21, %v257_v15  ;;  %v3196_v27 = vld [vmem:[%s4061_s4 + $0x1e0] sm:$0xff]  }
 0x100   :  { %289 = vst [vmem:[#allocation2] sm:$0xff] %v2871_v24  ;;  %v3562_v30 = vpack.c.bf16 %v260_v25, %v259_v21  ;;  %vm229_vm4 = vcmp.ge.f32.partialorder %v217_v26, 0.0  ;;  %v237_v31 = vmul.f32 0.2, %v217_v26  ;;  %v221_v33 = vadd.f32 %v220_v29, %v73_v61  ;;  %v222_v34 = vpop.f32.mrb[7].mxu0  ;;  %v3181_v61 = vld [vmem:[%s4061_s4 + $0x188] sm:$0xff]  }
 0x101   :  { %vm230_vm5 = vcmp.ge.f32.partialorder %v219_v28, 0.0  ;;  %v238_v35 = vmul.f32 0.2, %v219_v28  ;;  %v223_v37 = vadd.f32 %v222_v34, %v77_v62  ;;  %v3309_v48 = vpack.c.bf16 %v260_v25, %v258_v19  ;;  %v3185_v62 = vld [vmem:[%s4061_s4 + $0x1d0] sm:$0xff]  }
 0x102   :  { %v245_v38 = vsel %vm229_vm4, %v217_v26, %v237_v31  ;;  %vm231_vm6 = vcmp.ge.f32.partialorder %v221_v33, 0.0  ;;  %v239_v39 = vmul.f32 0.2, %v221_v33  ;;  %v379_v55 = vshll.u32 %v3308_v41, 16 }
 0x103   :  { %v261_v42 = vmul.f32 %v253_v32, %v245_v38  ;;  %v246_v43 = vsel %vm230_vm5, %v219_v28, %v238_v35  ;;  %vm232_vm7 = vcmp.ge.f32.partialorder %v223_v37, 0.0  ;;  %v240_v44 = vmul.f32 0.2, %v223_v37  ;;  %691 = vmatprep.mubr.bf16.mxu0 %v3309_v48 }
 0x104   :  { %v262_v46 = vmul.f32 %v254_v36, %v246_v43  ;;  %v247_v47 = vsel %vm231_vm6, %v221_v33, %v239_v39  ;;  %692 = vmatmul.mubr.bf16.vlgmr.msra.gmra.mrb[8].mxu0 %v3308_v41  ;;  %v391_v63 = vshll.u32 %v3309_v48, 16  ;;  %v381_v3 = vrot.slane %v379_v55, 1  ;;  %v3191_v43 = vld [vmem:[%s4061_s4 + $0x100] sm:$0xff]  }
 0x105   :  { %v263_v50 = vmul.f32 %v255_v40, %v247_v47  ;;  %v248_v51 = vsel %vm232_vm7, %v223_v37, %v240_v44  ;;  %2979 = vmatpush3.bf16.msra.mxu0 %v3177_v49  ;;  %v377_v6 = vshrl.u32 %v3308_v41, 16  ;;  %v389_v12 = vshrl.u32 %v3309_v48, 16  ;;  %v3197_v41 = vld [vmem:[%s4061_s4 + $0x1a0] sm:$0xff]  }
 0x106   :  { %v2873_v53 = vpack.c.bf16 %v262_v46, %v261_v42  ;;  %v264_v54 = vmul.f32 %v256_v45, %v248_v51  ;;  %2980 = vmatprep.subr.bf16.mxu0 %v3180_v52  ;;  %v393_v7 = vrot.slane %v391_v63, 1  ;;  %v3194_v52 = vld [vmem:[%s4061_s4 + $0x148] sm:$0xff]  }
 0x107   :  { %v707_v56 = vld [vmem:[#allocation2] sm:$0xcc]  ;;  %v382_v16 = vor.u32 %v381_v3, %v377_v6  ;;  %v3195_v63 = vld [vmem:[%s4061_s4 + $0x108] sm:$0xff]   ;;  %v3204_v3 = vld [vmem:[%s4061_s4 + $0x1f0] sm:$0xff]  }
 0x108   :  { %291 = vst [vmem:[#allocation2 + $0x10] sm:$0xff] %v2873_v53  ;;  %v2874_v59 = vpack.c.bf16 %v264_v54, %v263_v50  ;;  %v2596_v0 = vcombine.high %v707_v56, %v3562_v30  ;;  %v946_v2 = vld [vmem:[#allocation2] sm:$0x88]  ;;  %v2595_v4 = vcombine.low %v707_v56, %v3562_v30  ;;  %v394_v24 = vor.u32 %v393_v7, %v389_v12 }
 0x109   :  { %2981 = vmatpush3.bf16.msra.mxu0 %v3181_v61  ;;  %v2648_v8 = vcombine.high %v946_v2, %v3562_v30  ;;  %v2647_v11 = vcombine.low %v946_v2, %v3562_v30 }
 0x10a   :  { %292 = vst [vmem:[#allocation2 + $0x18] sm:$0x11] %v2874_v59  ;;  %2982 = vmatprep.subr.bf16.mxu0 %v3185_v62  ;;  %v779_v10 = vshrl.u32 %v2596_v0, 16  ;;  %v782_v13 = vshll.u32 %v2596_v0, 16  ;;  %v762_v17 = vshrl.u32 %v2595_v4, 16  ;;  %v765_v18 = vshll.u32 %v2595_v4, 16 }
 0x10b   :  { %v989_v26 = vrot.slane %v2648_v8, 3  ;;  %v986_v29 = vrot.slane %v2647_v11, 3  ;;  %v3201_v59 = vld [vmem:[%s4061_s4 + $0x1a8] sm:$0xff]   ;;  %v3198_v4 = vld [vmem:[%s4061_s4 + $0x150] sm:$0xff]  }
 0x10c   :  { %v781_v28 = vrot.slane %v779_v10, 2  ;;  %v784_v33 = vrot.slane %v782_v13, 3  ;;  %v764_v36 = vrot.slane %v762_v17, 2  ;;  %v767_v37 = vrot.slane %v765_v18, 3  ;;  %v3199_v11 = vld [vmem:[%s4061_s4 + $0x110] sm:$0xff]   ;;  %v3202_v13 = vld [vmem:[%s4061_s4 + $0x158] sm:$0xff]  }
 0x10d   :  { %2983 = vmatpush3.bf16.msra.mxu0 %v3187_v5  ;;  %v3206_v17 = vld [vmem:[%s4061_s4 + $0x160] sm:$0xff]  }
 0x10e   :  { %2984 = vmatprep.subr.bf16.mxu0 %v3192_v9  ;;  %v785_v0 = vor.u32 %v784_v33, %v781_v28  ;;  %v768_v5 = vor.u32 %v767_v37, %v764_v36  ;;  %v3205_v9 = vld [vmem:[%s4061_s4 + $0x1b0] sm:$0xff]   ;;  %v3207_v18 = vld [vmem:[%s4061_s4 + $0x120] sm:$0xff]  }
 0x10f   :  { %v295_v14 = vld [vmem:[#allocation2 + $0x10] sm:$0x33]  ;;  %v3300_v33 = vld [vmem:[%s4059_s1 + $0x44] ss:$8 sps:$4 sm:$0xff]  }
 0x110   :  { %v328_v15 = vld [vmem:[#allocation2 + $0x10] sm:$0x77]  ;;  %v2546_v19 = vcombine.high %v295_v14, %v295_v14  ;;  %v2545_v20 = vcombine.low %v295_v14, %v295_v14  ;;  %v3208_v14 = vld [vmem:[%s4061_s4 + $0x1f8] sm:$0xff]   ;;  %v3304_v37 = vld [vmem:[%s4059_s1 + $0x64] ss:$8 sps:$4 sm:$0xff]  }
 0x111   :  { %v2528_v21 = vcombine.high %v328_v15, %v328_v15  ;;  %v3598_v22 = vcombine.low %v328_v15, %v328_v15  ;;  %v710_v25 = vld [vmem:[#allocation2 + $0x18] sm:$0x11]  ;;  %2985 = vmatpush3.bf16.msra.mxu0 %v3193_v23 }
 0x112   :  { %699 = vmatprep.mubr.bf16.mxu0 %v2546_v19  ;;  %v3606_v31 = vcombine.high %v2873_v53, %v710_v25  ;;  %v3609_v35 = vcombine.low %v2873_v53, %v710_v25  ;;  %2986 = vmatprep.subr.bf16.mxu0 %v3196_v27  ;;  %v3200_v53 = vld [vmem:[%s4061_s4 + $0x1e8] sm:$0xff]   ;;  %v3209_v15 = vld [vmem:[%s4061_s4 + $0x1b8] sm:$0xff]  }
 0x113   :  { %v396_v30 = vshll.u32 %v2528_v21, 16  ;;  %v384_v32 = vshll.u32 %v3598_v22, 16  ;;  %700 = vmatmul.mubr.bf16.gmra.mrb[12].mxu0 %v2545_v20  ;;  %v403_v34 = vshrl.u32 %v2528_v21, 16  ;;  %v400_v8 = vshrl.u32 %v3598_v22, 16  ;;  %v3210_v19 = vld [vmem:[%s4061_s4 + $0x168] sm:$0xff]   ;;  %v3212_v21 = vld [vmem:[%s4061_s4 + $0x170] sm:$0xff]  }
 0x114   :  { %v990_v39 = vrot.slane %v3606_v31, 3  ;;  %v787_v42 = vshrl.u32 %v3606_v31, 16  ;;  %v790_v44 = vshll.u32 %v3606_v31, 16  ;;  %v987_v45 = vrot.slane %v3609_v35, 3  ;;  %v3211_v20 = vld [vmem:[%s4061_s4 + $0x128] sm:$0xff]   ;;  %v3213_v22 = vld [vmem:[%s4061_s4 + $0x130] sm:$0xff]  }
 0x115   :  { %v398_v38 = vrot.slane %v396_v30, 1  ;;  %v386_v40 = vrot.slane %v384_v32, 1  ;;  %v770_v46 = vshrl.u32 %v3609_v35, 16  ;;  %v773_v47 = vshll.u32 %v3609_v35, 16  ;;  %2987 = vmatpush3.bf16.msra.mxu0 %v3197_v41  ;;  %v3214_v23 = vld [vmem:[%s4061_s4 + $0x178] sm:$0xff]  }
 0x116   :  { %v991_v49 = vsel %vm985_vm9, %v989_v26, %v990_v39  ;;  %v789_v54 = vrot.slane %v787_v42, 2  ;;  %v792_v55 = vrot.slane %v790_v44, 3  ;;  %v988_v56 = vsel %vm985_vm9, %v986_v29, %v987_v45  ;;  %2988 = vmatprep.subr.bf16.mxu0 %v3200_v53  ;;  %v3292_v25 = vld [vmem:[%s4059_s1 + $0x4] ss:$8 sps:$4 sm:$0xff]   ;;  %v3293_v26 = vld [vmem:[%s4059_s1] ss:$8 sps:$4 sm:$0xff]  }
 0x117   :  { %v399_v48 = vsel %vm375_vm8, %v394_v24, %v398_v38  ;;  %v387_v50 = vsel %vm375_vm8, %v382_v16, %v386_v40  ;;  %v405_v51 = vor.u32 %v403_v34, %v398_v38  ;;  %1124 = vmatprep.mubr.bf16.mxu0 %v991_v49  ;;  %v772_v61 = vrot.slane %v770_v46, 2  ;;  %v3203_v16 = vld [vmem:[%s4061_s4 + $0x118] sm:$0xff]   ;;  %v3296_v29 = vld [vmem:[%s4059_s1 + $0x24] ss:$8 sps:$4 sm:$0xff]   ;;  %v3297_v30 = vld [vmem:[%s4059_s1 + $0x20] ss:$8 sps:$4 sm:$0xff]  }
 0x118   :  { %538 = vmatprep.mubr.bf16.mxu1 %v399_v48  ;;  %v775_v62 = vrot.slane %v773_v47, 3  ;;  %v793_v2 = vor.u32 %v792_v55, %v789_v54  ;;  %v402_v12 = vor.u32 %v400_v8, %v386_v40  ;;  %v3215_v24 = vld [vmem:[%s4061_s4 + $0x138] sm:$0xff]   ;;  %v3301_v34 = vld [vmem:[%s4059_s1 + $0x40] ss:$8 sps:$4 sm:$0xff]   ;;  %v3216_v40 = vld [vmem:[%s4060_s0 + $0x10] sm:$0xff]  }
 0x119   :  { %539 = vmatmul.mubr.bf16.vlgmr.msra.gmra.mrb[0].mxu1 %v387_v50  ;;  %2989 = vmatpush3.bf16.msra.mxu0 %v3201_v59  ;;  %v3294_v27 = vld [vmem:[%s4059_s1 + $0x14] ss:$8 sps:$4 sm:$0xff]   ;;  %v3295_v28 = vld [vmem:[%s4059_s1 + $0x10] ss:$8 sps:$4 sm:$0xff]   ;;  %v3305_v38 = vld [vmem:[%s4059_s1 + $0x60] ss:$8 sps:$4 sm:$0xff]  }
 0x11a   :  { %2951 = vmatpush3.bf16.msra.mxu1 %v3191_v43  ;;  %546 = vmatprep.mubr.bf16.mxu1 %v405_v51  ;;  %v776_v6 = vor.u32 %v775_v62, %v772_v61  ;;  %v794_v7 = vsel %vm760_vm10, %v785_v0, %v793_v2  ;;  %v3298_v31 = vld [vmem:[%s4059_s1 + $0x34] ss:$8 sps:$4 sm:$0xff]   ;;  %v3299_v32 = vld [vmem:[%s4059_s1 + $0x30] ss:$8 sps:$4 sm:$0xff]   ;;  %v3218_v43 = vld [vmem:[%s4061_s4 + $0x40] sm:$0xff]  }
 0x11b   :  { %2952 = vmatprep.subr.bf16.mxu1 %v3194_v52  ;;  %2990 = vmatprep.subr.bf16.mxu0 %v3204_v3  ;;  %v3302_v35 = vld [vmem:[%s4059_s1 + $0x54] ss:$8 sps:$4 sm:$0xff]   ;;  %v3303_v36 = vld [vmem:[%s4059_s1 + $0x50] ss:$8 sps:$4 sm:$0xff]   ;;  %v3219_v44 = vld [vmem:[%s4061_s4] sm:$0xff]  }
 0x11c   :  { %v777_v10 = vsel %vm760_vm10, %v768_v5, %v776_v6  ;;  %v3307_v41 = vld [vmem:[%s4059_s1 + $0x70] ss:$8 sps:$4 sm:$0xff]   ;;  %v3230_v50 = vld [vmem:[%s4061_s4 + $0x60] sm:$0xff]   ;;  %v3234_v54 = vld [vmem:[%s4061_s4 + $0x68] sm:$0xff]  }
 0x11d   :  { %2991 = vmatpush3.bf16.msra.mxu0 %v3205_v9  ;;  %v3217_v42 = vld [vmem:[%s4060_s0 + $0x18] sm:$0x1f]   ;;  %v3222_v46 = vld [vmem:[%s4061_s4 + $0x50] sm:$0xff]   ;;  %v3231_v51 = vld [vmem:[%s4061_s4 + $0x20] sm:$0xff]  }
 0x11e   :  { %2953 = vmatpush3.bf16.msra.mxu1 %v3195_v63  ;;  %2992 = vmatprep.subr.bf16.mxu0 %v3208_v14  ;;  %v3223_v47 = vld [vmem:[%s4061_s4 + $0x10] sm:$0xff]   ;;  %v3226_v48 = vld [vmem:[%s4061_s4 + $0x58] sm:$0xff]   ;;  %v3224_v52 = vld [vmem:[%s4061_s4 + $0xc0] sm:$0xff]  }
 0x11f   :  { %2954 = vmatprep.subr.bf16.mxu1 %v3198_v4  ;;  %v3227_v49 = vld [vmem:[%s4061_s4 + $0x18] sm:$0xff]   ;;  %v3225_v53 = vld [vmem:[%s4061_s4 + $0x80] sm:$0xff]   ;;  %v3235_v55 = vld [vmem:[%s4061_s4 + $0x28] sm:$0xff]  }
 0x120   :  { %v3229_v59 = vld [vmem:[%s4061_s4 + $0x88] sm:$0xff]   ;;  %v3238_v61 = vld [vmem:[%s4061_s4 + $0x70] sm:$0xff]   ;;  %v3243_v3 = vld [vmem:[%s4061_s4 + $0x38] sm:$0xff]  }
 0x121   :  { %547 = vmatmul.mubr.bf16.gmra.mrb[4].mxu1 %v402_v12  ;;  %2993 = vmatpush3.bf16.msra.mxu0 %v3209_v15  ;;  %v3239_v62 = vld [vmem:[%s4061_s4 + $0x30] sm:$0xff]   ;;  %v3236_v4 = vld [vmem:[%s4061_s4 + $0xd8] sm:$0xff]   ;;  %v3241_v8 = vld [vmem:[%s4061_s4 + $0xa0] sm:$0xff]  }
 0x122   :  { %2955 = vmatpush3.bf16.msra.mxu1 %v3199_v11  ;;  %927 = vmatprep.mubr.bf16.mxu1 %v794_v7  ;;  %v3232_v63 = vld [vmem:[%s4061_s4 + $0xd0] sm:$0xff]   ;;  %v3237_v5 = vld [vmem:[%s4061_s4 + $0x98] sm:$0xff]   ;;  %v3240_v7 = vld [vmem:[%s4061_s4 + $0xe0] sm:$0xff]  }
 0x123   :  { %2956 = vmatprep.subr.bf16.mxu1 %v3202_v13  ;;  %3006 = vmatprep.subr.bf16.mxu0 %v3224_v52  ;;  %v3233_v0 = vld [vmem:[%s4061_s4 + $0x90] sm:$0xff]   ;;  %v3244_v9 = vld [vmem:[%s4061_s4 + $0xe8] sm:$0xff]   ;;  %v3253_v13 = vld [vmem:[%s4061_s4 + $0xf8] sm:$0xff]  }
 0x124   :  { %1125 = vmatmul.mubr.bf16.vlgmr.msra.gmra.mrb[16].mxu0 %v988_v56  ;;  %v3228_v56 = vld [vmem:[%s4061_s4 + $0xc8] sm:$0xff]   ;;  %v3248_v11 = vld [vmem:[%s4061_s4 + $0xf0] sm:$0xff]   ;;  %v3254_v14 = vld [vmem:[%s4061_s4 + $0xb8] sm:$0xff]  }
 0x125   :  { %1132 = vmatprep.mubr.bf16.mxu0 %v990_v39  ;;  %v3306_v39 = vld [vmem:[%s4059_s1 + $0x74] ss:$8 sps:$4 sm:$0xff]   ;;  %3007 = vmatpush3.bf16.msra.mxu0 %v3225_v53  ;;  %v3260_v15 = vld [vmem:[%s4061_s4 + $0x140] sm:$0xff]   ;;  %v3856_v53 = vpop.permute.xlu0 %1164 }
 0x126   :  { %2957 = vmatpush3.bf16.msra.mxu1 %v3203_v16  ;;  %3008 = vmatprep.subr.bf16.mxu0 %v3228_v56  ;;  %v3249_v12 = vld [vmem:[%s4061_s4 + $0xb0] sm:$0xff]  }
 0x127   :  { %2958 = vmatprep.subr.bf16.mxu1 %v3206_v17 }
 0x129   :  { %3009 = vmatpush3.bf16.msra.mxu0 %v3229_v59 }
 0x12a   :  { %2959 = vmatpush3.bf16.msra.mxu1 %v3207_v18  ;;  %3010 = vmatprep.subr.bf16.mxu0 %v3232_v63 }
 0x12b   :  { %2960 = vmatprep.subr.bf16.mxu1 %v3210_v19 }
 0x12c   :  { %1133 = vmatmul.mubr.bf16.gmra.mrb[20].mxu0 %v987_v45  ;;  %v3220_v45 = vld [vmem:[%s4061_s4 + $0x48] sm:$0xff]  }
 0x12d   :  { %3011 = vmatpush3.bf16.msra.mxu0 %v3233_v0  ;;  %v3858_v0 = vpop.permute.xlu0 %1169 }
 0x12e   :  { %2961 = vmatpush3.bf16.msra.mxu1 %v3211_v20  ;;  %3012 = vmatprep.subr.bf16.mxu0 %v3236_v4 }
 0x12f   :  { %2962 = vmatprep.subr.bf16.mxu1 %v3212_v21 }
 0x131   :  { %3013 = vmatpush3.bf16.msra.mxu0 %v3237_v5 }
 0x132   :  { %2963 = vmatpush3.bf16.msra.mxu1 %v3213_v22  ;;  %3014 = vmatprep.subr.bf16.mxu0 %v3240_v7 }
 0x133   :  { %2964 = vmatprep.subr.bf16.mxu1 %v3214_v23 }
 0x135   :  { %3015 = vmatpush3.bf16.msra.mxu0 %v3241_v8 }
 0x136   :  { %2965 = vmatpush3.bf16.msra.mxu1 %v3215_v24  ;;  %3016 = vmatprep.subr.bf16.mxu0 %v3244_v9 }
 0x137   :  { %1330 = vmatprep.subr.bf16.mxu1 %v3292_v25 }
 0x139   :  { %928 = vmatmul.mubr.bf16.vlgmr.msra.gmra.mrb[8].mxu1 %v777_v10  ;;  %v3245_v10 = vld [vmem:[%s4061_s4 + $0xa8] sm:$0xff]  }
 0x13a   :  { %935 = vmatprep.mubr.bf16.mxu1 %v793_v2  ;;  %1331 = vmatpush1.bf16.msra.mxu1 %v3293_v26  ;;  %v3242_v2 = vld [vmem:[%s4061_s4 + $0x78] sm:$0xff]  }
 0x13b   :  { %1332 = vmatprep.subr.bf16.mxu1 %v3294_v27  ;;  %3017 = vmatpush3.bf16.msra.mxu0 %v3245_v10 }
 0x13c   :  { %3018 = vmatprep.subr.bf16.mxu0 %v3248_v11 }
 0x13e   :  { %1333 = vmatpush1.bf16.msra.mxu1 %v3295_v28 }
 0x13f   :  { %1334 = vmatprep.subr.bf16.mxu1 %v3296_v29  ;;  %3019 = vmatpush3.bf16.msra.mxu0 %v3249_v12 }
 0x140   :  { %3020 = vmatprep.subr.bf16.mxu0 %v3253_v13 }
 0x141   :  { %936 = vmatmul.mubr.bf16.gmra.mrb[12].mxu1 %v776_v6  ;;  %v3246_v6 = vld [vmem:[%s4061_s4 + $0x1c0] sm:$0xff]  }
 0x142   :  { %1335 = vmatpush1.bf16.msra.mxu1 %v3297_v30  ;;  %1362 = vmatprep.mubr.bf16.mxu1 %v3312_v1 }
 0x143   :  { %1336 = vmatprep.subr.bf16.mxu1 %v3298_v31  ;;  %3021 = vmatpush3.bf16.msra.mxu0 %v3254_v14 }
 0x144   :  { %3062 = vmatprep.subr.bf16.mxu0 %v3260_v15  ;;  %v3862_v15 = vpop.permute.xlu1 %1174 }
 0x146   :  { %1337 = vmatpush1.bf16.msra.mxu1 %v3299_v32 }
 0x147   :  { %1338 = vmatprep.subr.bf16.mxu1 %v3300_v33 }
 0x14a   :  { %1339 = vmatpush1.bf16.msra.mxu1 %v3301_v34 }
 0x14b   :  { %1340 = vmatprep.subr.bf16.mxu1 %v3302_v35 }
 0x14e   :  { %1341 = vmatpush1.bf16.msra.mxu1 %v3303_v36 }
 0x14f   :  { %1342 = vmatprep.subr.bf16.mxu1 %v3304_v37 }
 0x152   :  { %1343 = vmatpush1.bf16.msra.mxu1 %v3305_v38 }
 0x153   :  { %1344 = vmatprep.subr.bf16.mxu1 %v3306_v39 }
 0x156   :  { %1345 = vmatpush1.bf16.msra.mxu1 %v3307_v41 }
 0x157   :  { %3034 = vmatprep.subr.bf16.mxu1 %v3218_v43 }
 0x159   :  { %1363 = vmatmul.mubr.bf16.vlgmr.msra.gmra.mrb[16].mxu1 %v3216_v40 }
 0x15a   :  { %1372 = vmatprep.mubr.bf16.mxu1 %v3312_v1  ;;  %3035 = vmatpush3.bf16.msra.mxu1 %v3219_v44  ;;  %v3221_v1 = vld [vmem:[%s4061_s4 + $0x8] sm:$0xff]  }
 0x15b   :  { %3036 = vmatprep.subr.bf16.mxu1 %v3220_v45 }
 0x15e   :  { %3037 = vmatpush3.bf16.msra.mxu1 %v3221_v1 }
 0x15f   :  { %3038 = vmatprep.subr.bf16.mxu1 %v3222_v46 }
 0x161   :  { %1373 = vmatmul.mubr.bf16.gmra.mrb[20].mxu1 %v3217_v42 }
 0x162   :  { %3039 = vmatpush3.bf16.msra.mxu1 %v3223_v47 }
 0x163   :  { %3040 = vmatprep.subr.bf16.mxu1 %v3226_v48 }
 0x166   :  { %3041 = vmatpush3.bf16.msra.mxu1 %v3227_v49 }
 0x167   :  { %3042 = vmatprep.subr.bf16.mxu1 %v3230_v50 }
 0x16a   :  { %3043 = vmatpush3.bf16.msra.mxu1 %v3231_v51 }
 0x16b   :  { %3044 = vmatprep.subr.bf16.mxu1 %v3234_v54 }
 0x16e   :  { %3045 = vmatpush3.bf16.msra.mxu1 %v3235_v55 }
 0x16f   :  { %3046 = vmatprep.subr.bf16.mxu1 %v3238_v61 }
 0x172   :  { %3047 = vmatpush3.bf16.msra.mxu1 %v3239_v62 }
 0x173   :  { %3048 = vmatprep.subr.bf16.mxu1 %v3242_v2 }
 0x176   :  { %3049 = vmatpush3.bf16.msra.mxu1 %v3243_v3 }
 0x177   :  { %3090 = vmatprep.subr.bf16.mxu1 %v3246_v6 }
 0x1d7   :  { %v2938_v16 = vpop.f32.mrb[8].mxu0 }
 0x1d8   :  { %v2939_v17 = vpop.f32.mrb[9].mxu0 }
 0x1d9   :  { %v2940_v18 = vadd.f32 %v2939_v17, %v2938_v16  ;;  %v2941_v19 = vpop.f32.mrb[10].mxu0 }
 0x1da   :  { %v2942_v20 = vpop.f32.mrb[11].mxu0 }
 0x1db   :  { %v2943_v21 = vadd.f32 %v2942_v20, %v2941_v19 }
 0x1e6   :  { %v2944_v22 = vpop.f32.mrb[12].mxu0 }
 0x1e7   :  { %v2945_v23 = vpop.f32.mrb[13].mxu0 }
 0x1e8   :  { %v2946_v24 = vadd.f32 %v2945_v23, %v2944_v22  ;;  %v2947_v25 = vpop.f32.mrb[14].mxu0 }
 0x1e9   :  { %v2948_v26 = vpop.f32.mrb[15].mxu0  ;;  %v1226_v25 = vld [vmem:[%s4063_s2] sm:$0x3] }
 0x1ea   :  { %v1231_v26 = vrot.slane %v1226_v25, %v3541_v58 }
 0x1ec   :  { %v2910_v27 = vpop.f32.mrb[0].mxu1 }
 0x1ed   :  { %v2911_v28 = vpop.f32.mrb[1].mxu1 }
 0x1ee   :  { %v2912_v29 = vadd.f32 %v2911_v28, %v2910_v27  ;;  %v2913_v30 = vpop.f32.mrb[2].mxu1  ;;  %v1235_v27 = vrot.slane %v1226_v25, %v76_v60 }
 0x1ef   :  { %v2914_v31 = vpop.f32.mrb[3].mxu1 }
 0x1f0   :  { %v694_v32 = vadd.f32 %v2940_v18, %v2912_v29  ;;  %v2915_v33 = vadd.f32 %v2914_v31, %v2913_v30 }
 0x1f2   :  { %v697_v34 = vadd.f32 %v2943_v21, %v2915_v33 }
 0x1f4   :  { %v2916_v35 = vpop.f32.mrb[4].mxu1 }
 0x1f5   :  { %v2917_v36 = vpop.f32.mrb[5].mxu1 }
 0x1f6   :  { %v2918_v37 = vadd.f32 %v2917_v36, %v2916_v35  ;;  %v2919_v38 = vpop.f32.mrb[6].mxu1 }
 0x1f7   :  { %v2920_v39 = vpop.f32.mrb[7].mxu1  ;;  %v2994_v41 = vpop.f32.mrb[16].mxu0 }
 0x1f8   :  { %v702_v40 = vadd.f32 %v2946_v24, %v2918_v37  ;;  %v2995_v42 = vpop.f32.mrb[17].mxu0 }
 0x1f9   :  { %v2996_v43 = vadd.f32 %v2995_v42, %v2994_v41  ;;  %v2997_v44 = vpop.f32.mrb[18].mxu0 }
 0x1fa   :  { %v2998_v45 = vpop.f32.mrb[19].mxu0 }
 0x1fb   :  { %v2999_v1 = vadd.f32 %v2998_v45, %v2997_v44  ;;  %v1410_v44 = vld [vmem:[%s4064_s3 + $0x18] sm:$0xff] }
 0x1ff   :  { %v3000_v46 = vpop.f32.mrb[20].mxu0 }
 0x200   :  { %v3001_v47 = vpop.f32.mrb[21].mxu0 }
 0x201   :  { %v3002_v48 = vadd.f32 %v3001_v47, %v3000_v46  ;;  %v3003_v49 = vpop.f32.mrb[22].mxu0 }
 0x202   :  { %v3004_v50 = vpop.f32.mrb[23].mxu0 }
 0x20c   :  { %v2966_v51 = vpop.f32.mrb[8].mxu1 }
 0x20d   :  { %v2967_v52 = vpop.f32.mrb[9].mxu1 }
 0x20e   :  { %v2968_v54 = vadd.f32 %v2967_v52, %v2966_v51  ;;  %v2969_v55 = vpop.f32.mrb[10].mxu1 }
 0x20f   :  { %v2970_v56 = vpop.f32.mrb[11].mxu1 }
 0x210   :  { %v943_v59 = vadd.f32 %v2968_v54, %v694_v32  ;;  %v2971_v61 = vadd.f32 %v2970_v56, %v2969_v55 }
 0x212   :  { %v1140_v62 = vadd.f32 %v2996_v43, %v943_v59  ;;  %v944_v63 = vadd.f32 %v2971_v61, %v697_v34  ;;  %v1407_v34 = vld [vmem:[%s4064_s3] sm:$0xff] }
 0x213   :  { %v1411_v61 = vld [vmem:[%s4064_s3 + $0x20] sm:$0xff] }
 0x214   :  { %v1141_v2 = vadd.f32 %v2999_v1, %v944_v63  ;;  %v1177_v3 = vmul.f32 %v3856_v53, %v1140_v62  ;;  %v2972_v4 = vpop.f32.mrb[12].mxu1 }
 0x215   :  { %v2973_v5 = vpop.f32.mrb[13].mxu1 }
 0x216   :  { %v2888_v6 = vpack.c.bf16 %v1141_v2, %v1140_v62  ;;  %v1178_v7 = vmul.f32 %v3858_v0, %v1141_v2  ;;  %v2974_v8 = vadd.f32 %v2973_v5, %v2972_v4  ;;  %v2975_v9 = vpop.f32.mrb[14].mxu1  ;;  %v1191_v11 = vmul.f32 %v1177_v3, %v1140_v62 }
 0x217   :  { %v2976_v10 = vpop.f32.mrb[15].mxu1 }
 0x218   :  { %2889 = vst [vmem:[#allocation3] sm:$0xff] %v2888_v6   ;;  %v1180_v12 = vadd.f32 %v1178_v7, %v1177_v3  ;;  %v1192_v13 = vmul.f32 %v1178_v7, %v1141_v2  ;;  %v945_v14 = vadd.f32 %v2974_v8, %v702_v40  ;;  %v1409_v40 = vld [vmem:[%s4064_s3 + $0x10] sm:$0xff]  ;;  %v1412_v3 = vld [vmem:[%s4064_s3 + $0x28] sm:$0xff] }
 0x219   :  { %v1413_v7 = vld [vmem:[%s4064_s3 + $0x30] sm:$0x3] }
 0x21a   :  { %v1194_v16 = vadd.f32 %v1192_v13, %v1191_v11  ;;  %v1142_v17 = vadd.f32 %v3002_v48, %v945_v14 }
 0x21c   :  { %v2877_v18 = vpack.c.bf16 %v1142_v17, %v1142_v17  ;;  %v1179_v19 = vmul.f32 %v3862_v15, %v1142_v17 }
 0x21e   :  { %1161 = vst [vmem:[#allocation3 + $0x8] sm:$0x3] %v2877_v18  ;;  %v1182_v20 = vsel %vm1181_vm11, %v1179_v19, 0.0  ;;  %v1193_v21 = vmul.f32 %v1179_v19, %v1142_v17  ;;  %v3247_v17 = vld [vmem:[%s4061_s4 + $0x180] sm:$0xff]  }
 0x21f   :  { %v3866_v22 = vadd.f32 %v1182_v20, %v1180_v12  ;;  %v1414_v12 = vld [vmem:[%s4064_s3 + $0x38] sm:$0x3]  ;;  %v3250_v20 = vld [vmem:[%s4061_s4 + $0x1c8] sm:$0xff]  }
 0x220   :  { %v1195_v23 = vsel %vm1181_vm11, %v1193_v21, 0.0 }
 0x221   :  { %v3869_v24 = vadd.f32 %v1195_v23, %v1194_v16 }
 0x22c   :  { %v1364_v28 = vpop.f32.mrb[16].mxu1 }
 0x22d   :  { %v1365_v29 = vadd.f32 %v1364_v28, %v1231_v26  ;;  %v1366_v30 = vpop.f32.mrb[17].mxu1  ;;  %v3251_v28 = vld [vmem:[%s4061_s4 + $0x188] sm:$0xff]  }
 0x22e   :  { %v1367_v31 = vadd.f32 %v1366_v30, %v1235_v27  ;;  %v1368_v32 = vpop.f32.mrb[18].mxu1  ;;  %v3255_v30 = vld [vmem:[%s4061_s4 + $0x1d0] sm:$0xff]  }
 0x22f   :  { %vm1383_vm12 = vcmp.ge.f32.partialorder %v1365_v29, 0.0  ;;  %v1391_v33 = vmul.f32 0.2, %v1365_v29  ;;  %v1369_v35 = vadd.f32 %v1368_v32, %v1231_v26  ;;  %v1370_v36 = vpop.f32.mrb[19].mxu1 }
 0x230   :  { %vm1384_vm13 = vcmp.ge.f32.partialorder %v1367_v31, 0.0  ;;  %v1392_v37 = vmul.f32 0.2, %v1367_v31  ;;  %v1371_v60 = vadd.f32 %v1370_v36, %v1235_v27  ;;  %v3257_v36 = vld [vmem:[%s4061_s4 + $0x190] sm:$0xff]  }
 0x231   :  { %v1399_v38 = vsel %vm1383_vm12, %v1365_v29, %v1391_v33  ;;  %vm1385_vm14 = vcmp.ge.f32.partialorder %v1369_v35, 0.0  ;;  %v1393_v39 = vmul.f32 0.2, %v1369_v35  ;;  %vm2446_vm12 = vcmask 1041408  }
 0x232   :  { %v1415_v41 = vmul.f32 %v1407_v34, %v1399_v38  ;;  %v1400_v42 = vsel %vm1384_vm13, %v1367_v31, %v1392_v37  ;;  %vm1386_vm15 = vcmp.ge.f32.partialorder %v1371_v60, 0.0  ;;  %v1394_v43 = vmul.f32 0.2, %v1371_v60  ;;  %v3262_v38 = vld [vmem:[%s4061_s4 + $0x1d8] sm:$0xff]  }
 0x233   :  { %v1416_v45 = vmul.f32 %v1408_v57, %v1400_v42  ;;  %v1401_v1 = vsel %vm1385_vm14, %v1369_v35, %v1393_v39 }
 0x234   :  { %v1417_v46 = vmul.f32 %v1409_v40, %v1401_v1  ;;  %v1402_v47 = vsel %vm1386_vm15, %v1371_v60, %v1394_v43  ;;  %v1374_v48 = vpop.f32.mrb[20].mxu1 }
 0x235   :  { %v2878_v49 = vpack.c.bf16 %v1416_v45, %v1415_v41  ;;  %v1418_v50 = vmul.f32 %v1410_v44, %v1402_v47  ;;  %v1375_v51 = vadd.f32 %v1374_v48, %v1231_v26  ;;  %v1376_v52 = vpop.f32.mrb[21].mxu1 }
 0x236   :  { %v1377_v54 = vadd.f32 %v1376_v52, %v1235_v27  ;;  %v1378_v55 = vpop.f32.mrb[22].mxu1  ;;  %v3310_v8 = vpack.c.bf16 %v1417_v46, %v1415_v41 }
 0x237   :  { %1447 = vst [vmem:[#allocation2] sm:$0xff] %v2878_v49  ;;  %v3889_v56 = vpack.c.bf16 %v1418_v50, %v1417_v46  ;;  %vm1387_vm0 = vcmp.ge.f32.partialorder %v1375_v51, 0.0  ;;  %v1395_v59 = vmul.f32 0.2, %v1375_v51  ;;  %v1379_v62 = vadd.f32 %v1378_v55, %v1231_v26  ;;  %v1380_v63 = vpop.f32.mrb[23].mxu1 }
 0x238   :  { %vm1388_vm1 = vcmp.ge.f32.partialorder %v1377_v54, 0.0  ;;  %v1396_v2 = vmul.f32 0.2, %v1377_v54  ;;  %v1381_v4 = vadd.f32 %v1380_v63, %v1235_v27  ;;  %v3311_v16 = vpack.c.bf16 %v1418_v50, %v1416_v45  ;;  %v3263_v50 = vld [vmem:[%s4061_s4 + $0x198] sm:$0xff]  }
 0x239   :  { %v1403_v5 = vsel %vm1387_vm0, %v1375_v51, %v1395_v59  ;;  %vm1389_vm2 = vcmp.ge.f32.partialorder %v1379_v62, 0.0  ;;  %v1397_v6 = vmul.f32 0.2, %v1379_v62  ;;  %v1535_v25 = vshll.u32 %v3310_v8, 16 }
 0x23a   :  { %v1419_v9 = vmul.f32 %v1411_v61, %v1403_v5  ;;  %v1404_v10 = vsel %vm1388_vm1, %v1377_v54, %v1396_v2  ;;  %vm1390_vm3 = vcmp.ge.f32.partialorder %v1381_v4, 0.0  ;;  %v1398_v11 = vmul.f32 0.2, %v1381_v4  ;;  %1847 = vmatprep.mubr.bf16.mxu1 %v3311_v16 }
 0x23b   :  { %v1420_v13 = vmul.f32 %v1412_v3, %v1404_v10  ;;  %v1405_v14 = vsel %vm1389_vm2, %v1379_v62, %v1397_v6  ;;  %1848 = vmatmul.mubr.bf16.vlgmr.msra.gmra.mrb[24].mxu1 %v3310_v8  ;;  %v1547_v29 = vshll.u32 %v3311_v16, 16  ;;  %v1537_v33 = vrot.slane %v1535_v25, 1  ;;  %v3267_v10 = vld [vmem:[%s4061_s4 + $0x1a0] sm:$0xff]   ;;  %v3270_v25 = vld [vmem:[%s4061_s4 + $0x1e8] sm:$0xff]  }
 0x23c   :  { %v1421_v18 = vmul.f32 %v1413_v7, %v1405_v14  ;;  %v1406_v19 = vsel %vm1390_vm3, %v1381_v4, %v1398_v11  ;;  %3091 = vmatpush3.bf16.msra.mxu1 %v3247_v17  ;;  %v1533_v35 = vshrl.u32 %v3310_v8, 16  ;;  %v1545_v40 = vshrl.u32 %v3311_v16, 16 }
 0x23d   :  { %v2880_v21 = vpack.c.bf16 %v1420_v13, %v1419_v9  ;;  %v1422_v23 = vmul.f32 %v1414_v12, %v1406_v19  ;;  %3092 = vmatprep.subr.bf16.mxu1 %v3250_v20  ;;  %v1549_v37 = vrot.slane %v1547_v29, 1  ;;  %v3261_v12 = vld [vmem:[%s4061_s4 + $0x100] sm:$0xff]   ;;  %v3271_v29 = vld [vmem:[%s4061_s4 + $0x1a8] sm:$0xff]  }
 0x23e   :  { %v1863_v26 = vld [vmem:[#allocation2] sm:$0xcc]  ;;  %v1538_v44 = vor.u32 %v1537_v33, %v1533_v35  ;;  %v3274_v35 = vld [vmem:[%s4061_s4 + $0x1f0] sm:$0xff]  }
 0x23f   :  { %1449 = vst [vmem:[#allocation2 + $0x10] sm:$0xff] %v2880_v21  ;;  %v2881_v27 = vpack.c.bf16 %v1422_v23, %v1421_v18  ;;  %v2797_v31 = vcombine.high %v1863_v26, %v3889_v56  ;;  %v2100_v32 = vld [vmem:[#allocation2] sm:$0x88]  ;;  %v2796_v34 = vcombine.low %v1863_v26, %v3889_v56  ;;  %v1550_v51 = vor.u32 %v1549_v37, %v1545_v40  ;;  %v3264_v23 = vld [vmem:[%s4061_s4 + $0x148] sm:$0xff]  }
 0x240   :  { %3093 = vmatpush3.bf16.msra.mxu1 %v3251_v28  ;;  %v2848_v57 = vcombine.low %v2100_v32, %v3889_v56  ;;  %v2849_v60 = vcombine.high %v2100_v32, %v3889_v56  ;;  %v3266_v56 = vld [vmem:[%s4061_s4 + $0x1e0] sm:$0xff]   ;;  %v3265_v32 = vld [vmem:[%s4061_s4 + $0x108] sm:$0xff]  }
 0x241   :  { %1450 = vst [vmem:[#allocation2 + $0x18] sm:$0x11] %v2881_v27  ;;  %3094 = vmatprep.subr.bf16.mxu1 %v3255_v30  ;;  %v1933_v39 = vshrl.u32 %v2797_v31, 16  ;;  %v1936_v41 = vshll.u32 %v2797_v31, 16  ;;  %v1916_v45 = vshrl.u32 %v2796_v34, 16  ;;  %v1919_v1 = vshll.u32 %v2796_v34, 16 }
 0x242   :  { %v2138_v54 = vrot.slane %v2848_v57, 3  ;;  %v2141_v55 = vrot.slane %v2849_v60, 3 }
 0x243   :  { %v1935_v59 = vrot.slane %v1933_v39, 2  ;;  %v1938_v4 = vrot.slane %v1936_v41, 3  ;;  %v1918_v5 = vrot.slane %v1916_v45, 2  ;;  %v1921_v6 = vrot.slane %v1919_v1, 3  ;;  %v3275_v39 = vld [vmem:[%s4061_s4 + $0x1b0] sm:$0xff]   ;;  %v3279_v45 = vld [vmem:[%s4061_s4 + $0x1b8] sm:$0xff]  }
 0x244   :  { %3095 = vmatpush3.bf16.msra.mxu1 %v3257_v36  ;;  %v3268_v36 = vld [vmem:[%s4061_s4 + $0x150] sm:$0xff]   ;;  %v3273_v1 = vld [vmem:[%s4061_s4 + $0x118] sm:$0xff]  }
 0x245   :  { %3096 = vmatprep.subr.bf16.mxu1 %v3262_v38  ;;  %v1939_v33 = vor.u32 %v1938_v4, %v1935_v59  ;;  %v1922_v37 = vor.u32 %v1921_v6, %v1918_v5  ;;  %v3269_v41 = vld [vmem:[%s4061_s4 + $0x110] sm:$0xff]  }
 0x246   :  { %v1453_v42 = vld [vmem:[#allocation2 + $0x10] sm:$0x33] }
 0x247   :  { %v1486_v43 = vld [vmem:[#allocation2 + $0x10] sm:$0x77]  ;;  %v2747_v46 = vcombine.high %v1453_v42, %v1453_v42  ;;  %v2746_v47 = vcombine.low %v1453_v42, %v1453_v42 }
 0x248   :  { %v3925_v48 = vcombine.low %v1486_v43, %v1486_v43  ;;  %v2729_v49 = vcombine.high %v1486_v43, %v1486_v43  ;;  %v1866_v52 = vld [vmem:[#allocation2 + $0x18] sm:$0x11]  ;;  %3097 = vmatpush3.bf16.msra.mxu1 %v3263_v50  ;;  %v3282_v50 = vld [vmem:[%s4061_s4 + $0x170] sm:$0xff]  }
 0x249   :  { %1855 = vmatprep.mubr.bf16.mxu1 %v2747_v46  ;;  %v3933_v62 = vcombine.low %v2880_v21, %v1866_v52  ;;  %v3935_v63 = vcombine.high %v2880_v21, %v1866_v52  ;;  %3098 = vmatprep.subr.bf16.mxu1 %v3266_v56  ;;  %v3272_v43 = vld [vmem:[%s4061_s4 + $0x158] sm:$0xff]   ;;  %v3276_v46 = vld [vmem:[%s4061_s4 + $0x160] sm:$0xff]  }
 0x24a   :  { %v1552_v61 = vshll.u32 %v2729_v49, 16  ;;  %v1540_v2 = vshll.u32 %v3925_v48, 16  ;;  %1856 = vmatmul.mubr.bf16.gmra.mrb[28].mxu1 %v2746_v47  ;;  %v1559_v3 = vshrl.u32 %v2729_v49, 16  ;;  %v1556_v38 = vshrl.u32 %v3925_v48, 16  ;;  %v3277_v47 = vld [vmem:[%s4061_s4 + $0x120] sm:$0xff]   ;;  %v3280_v48 = vld [vmem:[%s4061_s4 + $0x168] sm:$0xff]  }
 0x24b   :  { %v2142_v8 = vrot.slane %v3935_v63, 3  ;;  %v1941_v11 = vshrl.u32 %v3935_v63, 16  ;;  %v1944_v13 = vshll.u32 %v3935_v63, 16  ;;  %v2139_v14 = vrot.slane %v3933_v62, 3  ;;  %v3281_v49 = vld [vmem:[%s4061_s4 + $0x128] sm:$0xff]   ;;  %v3284_v52 = vld [vmem:[%s4061_s4 + $0x178] sm:$0xff]  }
 0x24c   :  { %v1554_v7 = vrot.slane %v1552_v61, 1  ;;  %v1542_v9 = vrot.slane %v1540_v2, 1  ;;  %v1924_v16 = vshrl.u32 %v3933_v62, 16  ;;  %v1927_v17 = vshll.u32 %v3933_v62, 16  ;;  %3099 = vmatpush3.bf16.msra.mxu1 %v3267_v10 }
 0x24d   :  { %v2143_v19 = vsel %vm985_vm9, %v2141_v55, %v2142_v8  ;;  %v1943_v26 = vrot.slane %v1941_v11, 2  ;;  %v1946_v27 = vrot.slane %v1944_v13, 3  ;;  %v2140_v28 = vsel %vm985_vm9, %v2138_v54, %v2139_v14  ;;  %3100 = vmatprep.subr.bf16.mxu1 %v3270_v25  ;;  %v3285_v54 = vld [vmem:[%s4061_s4 + $0x138] sm:$0xff]  }
 0x24e   :  { %v1555_v18 = vsel %vm375_vm8, %v1550_v51, %v1554_v7  ;;  %v1543_v20 = vsel %vm375_vm8, %v1538_v44, %v1542_v9  ;;  %v1561_v21 = vor.u32 %v1559_v3, %v1554_v7  ;;  %2276 = vmatprep.mubr.bf16.mxu1 %v2143_v19  ;;  %v1926_v30 = vrot.slane %v1924_v16, 2  ;;  %v3278_v44 = vld [vmem:[%s4061_s4 + $0x1f8] sm:$0xff]   ;;  %v3283_v51 = vld [vmem:[%s4061_s4 + $0x130] sm:$0xff]  }
 0x24f   :  { %1694 = vmatprep.mubr.bf16.mxu0 %v1555_v18  ;;  %v1929_v31 = vrot.slane %v1927_v17, 3  ;;  %v1947_v34 = vor.u32 %v1946_v27, %v1943_v26  ;;  %v1558_v42 = vor.u32 %v1556_v38, %v1542_v9  ;;  %v3313_v55 = vmov 0.0  }
 0x250   :  { %1695 = vmatmul.mubr.bf16.vlgmr.msra.gmra.mrb[24].mxu0 %v1543_v20  ;;  %3101 = vmatpush3.bf16.msra.mxu1 %v3271_v29  ;;  %42 = vst [vmem:[#allocation4] sm:$0x1] %v3313_v55  ;;  %43 = vst [vmem:[#allocation5] sm:$0x1] %v3313_v55  ;;  %v15_v16 = vstv %s4065_s9 }
 0x251   :  { %3063 = vmatpush3.bf16.msra.mxu0 %v3261_v12  ;;  %1702 = vmatprep.mubr.bf16.mxu0 %v1561_v21  ;;  %v1930_v57 = vor.u32 %v1929_v31, %v1926_v30  ;;  %v1948_v60 = vsel %vm760_vm10, %v1939_v33, %v1947_v34  ;;  %16 = vst [vmem:[#allocation6] sm:$0x1] %v15_v16 }
 0x252   :  { %3064 = vmatprep.subr.bf16.mxu0 %v3264_v23  ;;  %3102 = vmatprep.subr.bf16.mxu1 %v3274_v35 }
 0x253   :  { %v1931_v40 = vsel %vm760_vm10, %v1922_v37, %v1930_v57  ;;  %vm2444_vm10 = vcmask 1040384  }
 0x254   :  { %3103 = vmatpush3.bf16.msra.mxu1 %v3275_v39 }
 0x255   :  { %3065 = vmatpush3.bf16.msra.mxu0 %v3265_v32  ;;  %3104 = vmatprep.subr.bf16.mxu1 %v3278_v44 }
 0x256   :  { %3066 = vmatprep.subr.bf16.mxu0 %v3268_v36 }
 0x258   :  { %1703 = vmatmul.mubr.bf16.gmra.mrb[28].mxu0 %v1558_v42  ;;  %3105 = vmatpush3.bf16.msra.mxu1 %v3279_v45 }
 0x259   :  { %3067 = vmatpush3.bf16.msra.mxu0 %v3269_v41  ;;  %2081 = vmatprep.mubr.bf16.mxu0 %v1948_v60 }
 0x25a   :  { %3068 = vmatprep.subr.bf16.mxu0 %v3272_v43 }
 0x25b   :  { %2277 = vmatmul.mubr.bf16.vlgmr.msra.gmra.mrb[32].mxu1 %v2140_v28 }
 0x25c   :  { %2284 = vmatprep.mubr.bf16.mxu1 %v2142_v8 }
 0x25d   :  { %3069 = vmatpush3.bf16.msra.mxu0 %v3273_v1 }
 0x25e   :  { %3070 = vmatprep.subr.bf16.mxu0 %v3276_v46 }
 0x261   :  { %3071 = vmatpush3.bf16.msra.mxu0 %v3277_v47 }
 0x262   :  { %3072 = vmatprep.subr.bf16.mxu0 %v3280_v48 }
 0x263   :  { %2285 = vmatmul.mubr.bf16.gmra.mrb[36].mxu1 %v2139_v14 }
 0x265   :  { %3073 = vmatpush3.bf16.msra.mxu0 %v3281_v49 }
 0x266   :  { %3074 = vmatprep.subr.bf16.mxu0 %v3282_v50 }
 0x269   :  { %3075 = vmatpush3.bf16.msra.mxu0 %v3283_v51 }
 0x26a   :  { %3076 = vmatprep.subr.bf16.mxu0 %v3284_v52  ;;  %v1184_v52 = vrot.slane %v3866_v22, 4 }
 0x26d   :  { %3077 = vmatpush3.bf16.msra.mxu0 %v3285_v54 }
 0x270   :  { %2082 = vmatmul.mubr.bf16.vlgmr.msra.gmra.mrb[32].mxu0 %v1931_v40 }
 0x271   :  { %2089 = vmatprep.mubr.bf16.mxu0 %v1947_v34 }
 0x278   :  { %2090 = vmatmul.mubr.bf16.gmra.mrb[36].mxu0 %v1930_v57 }
 0x30e   :  { %v3050_v56 = vpop.f32.mrb[24].mxu1 }
 0x30f   :  { %v3051_v59 = vpop.f32.mrb[25].mxu1 }
 0x310   :  { %v3052_v61 = vadd.f32 %v3051_v59, %v3050_v56  ;;  %v3053_v63 = vpop.f32.mrb[26].mxu1 }
 0x311   :  { %v3054_v2 = vpop.f32.mrb[27].mxu1 }
 0x312   :  { %v3055_v62 = vadd.f32 %v3054_v2, %v3053_v63  ;;  %v1197_v63 = vrot.slane %v3869_v24, 4 }
 0x31d   :  { %v3056_v3 = vpop.f32.mrb[28].mxu1 }
 0x31e   :  { %v3057_v4 = vpop.f32.mrb[29].mxu1 }
 0x31f   :  { %v3058_v5 = vadd.f32 %v3057_v4, %v3056_v3  ;;  %v3059_v6 = vpop.f32.mrb[30].mxu1 }
 0x320   :  { %v3060_v7 = vpop.f32.mrb[31].mxu1 }
 0x323   :  { %v3022_v8 = vpop.f32.mrb[24].mxu0 }
 0x324   :  { %v3023_v9 = vpop.f32.mrb[25].mxu0 }
 0x325   :  { %v3024_v10 = vadd.f32 %v3023_v9, %v3022_v8  ;;  %v3025_v11 = vpop.f32.mrb[26].mxu0 }
 0x326   :  { %v3026_v12 = vpop.f32.mrb[27].mxu0 }
 0x327   :  { %v1850_v13 = vadd.f32 %v3052_v61, %v3024_v10  ;;  %v3027_v14 = vadd.f32 %v3026_v12, %v3025_v11 }
 0x329   :  { %v1853_v17 = vadd.f32 %v3055_v62, %v3027_v14  ;;  %v1185_v62 = vadd.f32 %v1184_v52, %v3866_v22 }
 0x32b   :  { %v3028_v18 = vpop.f32.mrb[28].mxu0  ;;  %v1186_v7 = vrot.slane %v1185_v62, 2 }
 0x32c   :  { %v3029_v19 = vpop.f32.mrb[29].mxu0 }
 0x32d   :  { %v3030_v20 = vadd.f32 %v3029_v19, %v3028_v18  ;;  %v3031_v21 = vpop.f32.mrb[30].mxu0 }
 0x32e   :  { %v3032_v23 = vpop.f32.mrb[31].mxu0  ;;  %v3106_v26 = vpop.f32.mrb[32].mxu1 }
 0x32f   :  { %v1858_v25 = vadd.f32 %v3058_v5, %v3030_v20  ;;  %v3107_v27 = vpop.f32.mrb[33].mxu1 }
 0x330   :  { %v3108_v28 = vadd.f32 %v3107_v27, %v3106_v26  ;;  %v3109_v29 = vpop.f32.mrb[34].mxu1 }
 0x331   :  { %v3110_v30 = vpop.f32.mrb[35].mxu1 }
 0x332   :  { %v3111_v31 = vadd.f32 %v3110_v30, %v3109_v29 }
 0x336   :  { %v3112_v32 = vpop.f32.mrb[36].mxu1 }
 0x337   :  { %v3113_v33 = vpop.f32.mrb[37].mxu1 }
 0x338   :  { %v3114_v34 = vadd.f32 %v3113_v33, %v3112_v32  ;;  %v3115_v35 = vpop.f32.mrb[38].mxu1  ;;  %v2343_v32 = vld [vmem:[#allocation5] sm:$0x1] }
 0x339   :  { %v3116_v36 = vpop.f32.mrb[39].mxu1 }
 0x343   :  { %v3078_v37 = vpop.f32.mrb[32].mxu0 }
 0x344   :  { %v3079_v57 = vpop.f32.mrb[33].mxu0 }
 0x345   :  { %v3080_v60 = vadd.f32 %v3079_v57, %v3078_v37  ;;  %v3081_v38 = vpop.f32.mrb[34].mxu0 }
 0x346   :  { %v3082_v39 = vpop.f32.mrb[35].mxu0 }
 0x347   :  { %v2097_v40 = vadd.f32 %v3080_v60, %v1850_v13  ;;  %v3083_v41 = vadd.f32 %v3082_v39, %v3081_v38  ;;  %v1187_v13 = vadd.f32 %v1186_v7, %v1185_v62 }
 0x349   :  { %v2292_v42 = vadd.f32 %v3108_v28, %v2097_v40  ;;  %v2098_v43 = vadd.f32 %v3083_v41, %v1853_v17  ;;  %v2340_v28 = vld [vmem:[#allocation4] sm:$0x1]  ;;  %v2355_v41 = vld [vmem:[%s4066_s6] sm:$0x1] }
 0x34b   :  { %v2882_v44 = vpack.c.bf16 %v2292_v42, %v2292_v42  ;;  %v2314_v45 = vmul.f32 %v2292_v42, %v3856_v53  ;;  %v2293_v1 = vadd.f32 %v3111_v31, %v2098_v43  ;;  %v3084_v46 = vpop.f32.mrb[36].mxu0 }
 0x34c   :  { %v3085_v47 = vpop.f32.mrb[37].mxu0 }
 0x34d   :  { %2311 = vst [vmem:[#allocation3 + $0xc] sm:$0xf] %v2882_v44  ;;  %v2883_v48 = vpack.c.bf16 %v2293_v1, %v2293_v1  ;;  %v2315_v49 = vmul.f32 %v2293_v1, %v3858_v0  ;;  %v3086_v50 = vadd.f32 %v3085_v47, %v3084_v46  ;;  %v3087_v51 = vpop.f32.mrb[38].mxu0  ;;  %v2327_v55 = vmul.f32 %v2314_v45, %v2292_v42  ;;  %v2891_v44 = vld [vmem:[#allocation3] sm:$0xff]  }
 0x34e   :  { %v3088_v54 = vpop.f32.mrb[39].mxu0  ;;  %v1198_v0 = vadd.f32 %v1197_v63, %v3869_v24  ;;  %v2893_v52 = vunpack.c.h.bf16 %v2891_v44 }
 0x34f   :  { %2312 = vst [vmem:[#allocation3 + $0x10] sm:$0xf] %v2883_v48  ;;  %v2317_v56 = vadd.f32 %v2315_v49, %v2314_v45  ;;  %v2328_v59 = vmul.f32 %v2315_v49, %v2293_v1  ;;  %v2099_v61 = vadd.f32 %v3086_v50, %v1858_v25  ;;  %v2359_v45 = vld [vmem:[%s4067_s7] sm:$0x1]  ;;  %v2367_v1 = vld [vmem:[#allocation3 + $0x8] sm:$0x3]  ;;  %v2892_v50 = vunpack.c.l.bf16 %v2891_v44 }
 0x350   :  { %v1199_v10 = vrot.slane %v1198_v0, 2  ;;  %v2370_v54 = vunpack.c.l.bf16 %v2367_v1 }
 0x351   :  { %v2330_v53 = vadd.f32 %v2328_v59, %v2327_v55  ;;  %v2294_v2 = vadd.f32 %v3114_v34, %v2099_v61 }
 0x352   :  { %v1200_v22 = vadd.f32 %v1199_v10, %v1198_v0 }
 0x353   :  { %v2884_v3 = vpack.c.bf16 %v2294_v2, %v2294_v2  ;;  %v2316_v4 = vmul.f32 %v2294_v2, %v3862_v15  ;;  %v1188_v15 = vrot.slane %v1187_v13, 1 }
 0x354   :  { %v1201_v20 = vrot.slane %v1200_v22, 1 }
 0x355   :  { %2313 = vst [vmem:[#allocation3 + $0x14] sm:$0x3] %v2884_v3  ;;  %v2318_v5 = vsel %vm1181_vm11, %v2316_v4, 0.0  ;;  %v2329_v6 = vmul.f32 %v2316_v4, %v2294_v2  ;;  %v1189_v25 = vadd.f32 %v1188_v15, %v1187_v13 }
 0x356   :  { %v2319_v8 = vadd.f32 %v2318_v5, %v2317_v56  ;;  %v1202_v29 = vadd.f32 %v1201_v20, %v1200_v22  ;;  %v2411_v46 = vld [vmem:[#allocation3 + $0xc] sm:$0xff]  }
 0x357   :  { %v2331_v9 = vsel %vm1181_vm11, %v2329_v6, 0.0  ;;  %v2414_v55 = vunpack.c.l.bf16 %v2411_v46  ;;  %v2415_v59 = vunpack.c.h.bf16 %v2411_v46 }
 0x358   :  { %v2320_v11 = vrot.slane %v2319_v8, 4  ;;  %v2332_v12 = vadd.f32 %v2331_v9, %v2330_v53  ;;  %v2364_v9 = vld [vmem:[%s4068_s8 + $0x10] sm:$0xf] }
 0x35a   :  { %v2321_v14 = vadd.f32 %v2320_v11, %v2319_v8  ;;  %v2333_v16 = vrot.slane %v2332_v12, 4  ;;  %v2362_v8 = vld [vmem:[%s4068_s8] sm:$0xff] }
 0x35c   :  { %v2322_v17 = vrot.slane %v2321_v14, 2  ;;  %v2334_v18 = vadd.f32 %v2333_v16, %v2332_v12  ;;  %v2413_v49 = vld [vmem:[#allocation3 + $0x14] sm:$0x3] }
 0x35d   :  { %v2416_v61 = vunpack.c.l.bf16 %v2413_v49 }
 0x35e   :  { %v2323_v19 = vadd.f32 %v2322_v17, %v2321_v14  ;;  %v2335_v24 = vrot.slane %v2334_v18, 2 }
 0x360   :  { %v2324_v21 = vrot.slane %v2323_v19, 1  ;;  %v2336_v23 = vadd.f32 %v2335_v24, %v2334_v18 }
 0x362   :  { %v2325_v26 = vadd.f32 %v2324_v21, %v2323_v19  ;;  %v2337_v27 = vrot.slane %v2336_v23, 1 }
 0x364   :  { %v2326_v30 = vadd.f32 %v2325_v26, %v1189_v25  ;;  %v2338_v31 = vadd.f32 %v2337_v27, %v2336_v23 }
 0x366   :  { %v2339_v33 = vadd.f32 %v2338_v31, %v1202_v29  ;;  %v2341_v34 = vadd.f32 %v2340_v28, %v2326_v30 }
 0x368   :  { %2342 = vst [vmem:[#allocation4] sm:$0x1] %v2341_v34  ;;  %v2344_v35 = vadd.f32 %v2343_v32, %v2339_v33 }
 0x36a   :  { %2345 = vst [vmem:[#allocation5] sm:$0x1] %v2344_v35 }
 0x36f   :  { %v2349_v36 = vld [vmem:[#allocation4] sm:$0x1] }
 0x370   :  { %v2350_v37 = vmul.f32 0.03125, %v2349_v36 }
 0x371   :  { %v2351_v57 = vld [vmem:[#allocation5] sm:$0x1] }
 0x372   :  { %v2352_v60 = vmul.f32 0.03125, %v2351_v57  ;;  %v2353_v38 = vmul.f32 %v2350_v37, %v2350_v37 }
 0x374   :  { %v2354_v39 = vsub.f32 %v2352_v60, %v2353_v38 }
 0x376   :  { %v2356_v40 = vadd.f32 1e-05, %v2354_v39 }
 0x378   :  { %3286 = vrsqrt.f32 %v2356_v40 }
 0x382   :  { %v3287_v42 = vpop.eup %3286 }
 0x383   :  { %v2358_v43 = vmul.f32 %v3287_v42, %v2355_v41 }
 0x385   :  { %v2360_v47 = vmul.f32 %v2358_v43, %v2350_v37  ;;  %v2375_v48 = vrot.slane %v2358_v43, %v3541_v58 }
 0x387   :  { %v2361_v51 = vsub.f32 %v2359_v45, %v2360_v47  ;;  %v2377_v56 = vmul.f32 %v2892_v50, %v2375_v48  ;;  %v2378_v63 = vmul.f32 %v2893_v52, %v2375_v48  ;;  %v2379_v53 = vmul.f32 %v2375_v48, %v2370_v54  ;;  %v2869_v47 = vld [vmem:[#allocation6] ss:$0 sm:$0xff] }
 0x388   :  { %v2417_v62 = vmul.f32 %v2414_v55, %v2375_v48  ;;  %v2418_v3 = vmul.f32 %v2415_v59, %v2375_v48  ;;  %v2419_v4 = vmul.f32 %v2416_v61, %v2375_v48 }
 0x389   :  { %v2384_v2 = vrot.slane %v2361_v51, %v3541_v58  ;;  %v2363_v58 = vld [vmem:[%s4068_s8 + $0x8] sm:$0xff] }
 0x38b   :  { %v2386_v0 = vadd.f32 %v2384_v2, %v2377_v56  ;;  %v2387_v5 = vadd.f32 %v2384_v2, %v2378_v63  ;;  %v2388_v6 = vadd.f32 %v2384_v2, %v2379_v53  ;;  %v2420_v7 = vadd.f32 %v2417_v62, %v2384_v2 }
 0x38c   :  { %v2421_v10 = vadd.f32 %v2418_v3, %v2384_v2  ;;  %v2422_v11 = vadd.f32 %v2419_v4, %v2384_v2 }
 0x38d   :  { %vm2389_vm4 = vcmp.ge.f32.partialorder %v2386_v0, 0.0  ;;  %vm2390_vm5 = vcmp.ge.f32.partialorder %v2387_v5, 0.0  ;;  %vm2391_vm6 = vcmp.ge.f32.partialorder %v2388_v6, 0.0  ;;  %v2392_v12 = vmul.f32 0.2, %v2386_v0 }
 0x38e   :  { %v2393_v13 = vmul.f32 0.2, %v2387_v5  ;;  %v2394_v14 = vmul.f32 0.2, %v2388_v6  ;;  %vm2423_vm7 = vcmp.ge.f32.partialorder %v2420_v7, 0.0  ;;  %vm2424_vm8 = vcmp.ge.f32.partialorder %v2421_v10, 0.0 }
 0x38f   :  { %v2395_v16 = vsel %vm2389_vm4, %v2386_v0, %v2392_v12  ;;  %vm2425_vm9 = vcmp.ge.f32.partialorder %v2422_v11, 0.0  ;;  %v2426_v22 = vmul.f32 0.2, %v2420_v7  ;;  %v2427_v17 = vmul.f32 0.2, %v2421_v10 }
 0x390   :  { %v2396_v18 = vsel %vm2390_vm5, %v2387_v5, %v2393_v13  ;;  %v2397_v15 = vsel %vm2391_vm6, %v2388_v6, %v2394_v14  ;;  %v2398_v19 = vmul.f32 %v2395_v16, %v2362_v8  ;;  %v2428_v24 = vmul.f32 0.2, %v2422_v11 }
 0x391   :  { %v2399_v20 = vmul.f32 %v2396_v18, %v2363_v58  ;;  %v2400_v21 = vmul.f32 %v2397_v15, %v2364_v9  ;;  %v2429_v23 = vsel %vm2423_vm7, %v2420_v7, %v2426_v22  ;;  %v2430_v25 = vsel %vm2424_vm8, %v2421_v10, %v2427_v17 }
 0x392   :  { %v2431_v26 = vsel %vm2425_vm9, %v2422_v11, %v2428_v24  ;;  %v2432_v27 = vmul.f32 %v2429_v23, %v2362_v8  ;;  %v2433_v28 = vmul.f32 %v2430_v25, %v2363_v58 }
 0x393   :  { %v2401_v29 = vadd.f32 %v2399_v20, %v2398_v19  ;;  %v2402_v30 = vsel %vm1181_vm11, %v2400_v21, 0.0  ;;  %v2434_v31 = vmul.f32 %v2431_v26, %v2364_v9 }
 0x394   :  { %v2435_v32 = vadd.f32 %v2433_v28, %v2432_v27 }
 0x395   :  { %v2403_v33 = vadd.f32 %v2402_v30, %v2401_v29  ;;  %v2436_v34 = vsel %vm1181_vm11, %v2434_v31, 0.0  ;;  %vm2464_vm11 = vcmask 1024  }
 0x396   :  { %v2437_v35 = vadd.f32 %v2436_v34, %v2435_v32 }
 0x397   :  { %v2404_v36 = vrot.slane %v2403_v33, 4 }
 0x398   :  { %v2438_v37 = vrot.slane %v2437_v35, 4 }
 0x399   :  { %v2405_v57 = vadd.f32 %v2404_v36, %v2403_v33 }
 0x39a   :  { %v2439_v60 = vadd.f32 %v2438_v37, %v2437_v35 }
 0x39b   :  { %v2406_v38 = vrot.slane %v2405_v57, 2 }
 0x39c   :  { %v2440_v39 = vrot.slane %v2439_v60, 2 }
 0x39d   :  { %v2407_v40 = vadd.f32 %v2406_v38, %v2405_v57 }
 0x39e   :  { %v2441_v41 = vadd.f32 %v2440_v39, %v2439_v60 }
 0x39f   :  { %v2408_v42 = vrot.slane %v2407_v40, 1 }
 0x3a0   :  { %v2442_v43 = vrot.slane %v2441_v41, 1 }
 0x3a1   :  { %v2409_v44 = vadd.f32 %v2408_v42, %v2407_v40 }
 0x3a2   :  { %v2443_v45 = vadd.f32 %v2442_v43, %v2441_v41 }
 0x3a4   :  { %v2445_v1 = vsel %vm2444_vm10, %v2409_v44, %v2443_v45 }
 0x3a5   :  { %v2447_v46 = vsel %vm2446_vm12, %v2445_v1, 0.0 }
 0x3a6   :  { %2448 = vadd.xlane.f32.xlu1 %v2447_v46 }
 0x433   :  { %v2449_v48 = vpop.xlane.xlu1 %2448 }
 0x434   :  { %v2457_v49 = vadd.f32 %v2869_v47, %v2449_v48 }
 0x436   :  { %v2870_v50 = vmul.f32 -1.442695, %v2457_v49 }
 0x438   :  { %3288 = vpow2.f32 %v2870_v50 }
 0x442   :  { %v3289_v51 = vpop.eup %3288 }
 0x443   :  { %v2461_v52 = vadd.f32 1.0, %v3289_v51 }
 0x445   :  { %3290 = vrcp.f32 %v2461_v52 }
 0x44f   :  { %v3291_v54 = vpop.eup %3290 }
 0x450   :  { %2465 = vst.msk [vmem:[%s4069_s10] sm:$0x3] %vm2464_vm11, %v3291_v54 }

</bundles_post_ra>
